<compile_context>
chip_gen: v7x
topology: tpu7x:2x2x1
jax: 0.10.0
libtpu: 0.0.40
codegen_flags: <defaults>
</compile_context>

<pallas_src>
import jax
import jax.numpy as jnp
from jax.experimental import pallas as pl
from jax.experimental.pallas import tpu as pltpu


def _fusemoe_kernel(x_ref, wg1_ref, bg1_ref, wg2_ref, bg2_ref,
                    w1_ref, b1_ref, w2_ref, b2_ref, sel_ref,
                    out_ref, gates_ref,
                    gates_sc, acc_sc):
    k = pl.program_id(1)
    x = x_ref[...]                                                   # bf16 [tn, I]

    # ---- Gating (once per row tile): Linear -> ReLU -> (Dropout=id) -> Linear -> Softmax(dim=1)
    @pl.when(k == 0)
    def _():
        hg = jnp.dot(x, wg1_ref[...], preferred_element_type=jnp.float32) + bg1_ref[...]
        hg = jnp.maximum(hg, 0.0)
        logits = (jnp.dot(hg.astype(wg2_ref.dtype), wg2_ref[...],
                          preferred_element_type=jnp.float32) + bg2_ref[...])
        m = jnp.max(logits, axis=1, keepdims=True)
        p = jnp.exp(logits - m)
        g = p / jnp.sum(p, axis=1, keepdims=True)                    # f32 [tn, E]
        gates_sc[...] = g
        gates_ref[...] = g.astype(gates_ref.dtype)
        acc_sc[...] = jnp.zeros_like(acc_sc)

    gates_c = gates_sc[...].astype(sel_ref.dtype)                    # bf16 [tn, E]

    # ---- All experts, current E*H tile: Linear -> ReLU -> gate-scale -> Linear (accumulate)
    h = jnp.dot(x, w1_ref[...], preferred_element_type=jnp.float32) + b1_ref[...]
    h = jnp.maximum(h, 0.0)                                          # f32 [tn, tk]
    # Broadcast gate e across its H-wide slab with a tiny bf16 [E, tk] 0/1 matmul.
    gb = jnp.dot(gates_c, sel_ref[...], preferred_element_type=jnp.float32)     # [tn, tk]
    hs = (h * gb).astype(w2_ref.dtype)                               # bf16 for the MXU
    acc_sc[...] += jnp.dot(hs, w2_ref[...], preferred_element_type=jnp.float32)  # [tn, Op]

    @pl.when(k == pl.num_programs(1) - 1)
    def _():
        out = acc_sc[...] + jnp.dot(gates_c, b2_ref[...],
                                    preferred_element_type=jnp.float32)
        out_ref[...] = out.astype(out_ref.dtype)


def _round_up(a, b):
    return (a + b - 1) // b * b


def _choose_tile_n(n, max_tile=256):
    """Row tile: multiple of 16 (bf16 sublane packing), <= max_tile, and when possible
    >= 2 grid steps so both v7x TensorCores get work."""
    tn = min(max_tile, _round_up(n, 16))
    if n > 16 and _round_up(n, tn) // tn < 2:
        tn = _round_up(pl.cdiv(n, 2), 16)
    return tn


def _choose_tile_eh(num_experts, hidden, max_tile=2048):
    """E*H reduction tile: an integer number of expert slabs, lane-aligned (mult of 128)."""
    eh = num_experts * hidden
    if eh <= max_tile:
        return eh
    for d in range(num_experts, 0, -1):
        tk = d * hidden
        if num_experts % d == 0 and tk <= max_tile and tk % 128 == 0:
            return tk
    return eh  # TODO(synk): hidden not 128-aligned -> keep E*H fully resident


def _vmem_limit_bytes():
    kind = ""
    try:
        kind = jax.devices()[0].device_kind.lower()
    except Exception:
        pass
    # v5e/v6e (and older) have 128 MiB VMEM per TensorCore; default conservatively for v7x (64 MiB).
    big_vmem = any(t in kind for t in ("v3", "v4", "v5", "v6"))
    return (100 if big_vmem else 48) * 1024 * 1024


def pygmo_fusemoe_forward(x, params, *, compute_dtype=jnp.bfloat16,
                          max_tile_n=256, max_tile_eh=2048):
    """x: [N, input_size] float32. Returns (out [N, O], gates [N, E])."""
    (wg1, bg1, wg2, bg2, we1, be1, we2, be2) = params
    N, I = x.shape
    E, _, H = we1.shape
    O = we2.shape[2]
    H2 = wg1.shape[1]
    EH = E * H

    tn = _choose_tile_n(N, max_tile_n)
    n_pad = _round_up(N, tn)
    tk = _choose_tile_eh(E, H, max_tile_eh)
    o_pad = _round_up(O, 128)                    # lane-dense output stores (no vst.msk)
    n_rows, n_k = n_pad // tn, EH // tk

    # Lane-concatenated expert weights: column block e of w1cat is expert e's first layer.
    w1cat = jnp.transpose(we1, (1, 0, 2)).reshape(I, EH).astype(compute_dtype)   # [I, E*H]
    b1cat = be1.reshape(1, EH).astype(jnp.float32)                               # [1, E*H]
    w2flat = we2.reshape(EH, O)
    b2flat = be2.reshape(E, O)
    if o_pad != O:
        w2flat = jnp.pad(w2flat, ((0, 0), (0, o_pad - O)))
        b2flat = jnp.pad(b2flat, ((0, 0), (0, o_pad - O)))
    w2flat = w2flat.astype(compute_dtype)                                         # [E*H, Op]
    b2flat = b2flat.astype(compute_dtype)                                         # [E,   Op]
    # 0/1 block-broadcast matrix: row e has ones on columns [e*H, (e+1)*H).
    sel = jnp.repeat(jnp.eye(E, dtype=compute_dtype), H, axis=1)                  # [E, E*H]

    xc = x.astype(compute_dtype)
    if n_pad != N:
        xc = jnp.pad(xc, ((0, n_pad - N), (0, 0)))
    wg1c, wg2c = wg1.astype(compute_dtype), wg2.astype(compute_dtype)
    bg1f, bg2f = bg1.astype(jnp.float32), bg2.astype(jnp.float32)

    def build(single_buffer):
        def const2d(shape):                      # resident, never re-fetched
            pm = pl.Buffered(1) if single_buffer else None
            return pl.BlockSpec(shape, lambda i, k: (0, 0), pipeline_mode=pm)

        def stream(shape, index_map):            # streamed over the E*H axis
            pm = pl.Buffered(1) if (single_buffer and n_k == 1) else None
            return pl.BlockSpec(shape, index_map, pipeline_mode=pm)

        grid_spec = pltpu.PrefetchScalarGridSpec(
            num_scalar_prefetch=0,
            grid=(n_rows, n_k),
            in_specs=[
                pl.BlockSpec((tn, I), lambda i, k: (i, 0)),          # x (tiled over rows)
                const2d((I, H2)),                                    # wg1
                const2d((1, H2)),                                    # bg1
                const2d((H2, E)),                                    # wg2
                const2d((1, E)),                                     # bg2
                stream((I, tk), lambda i, k: (0, k)),                # w1cat tile
                stream((1, tk), lambda i, k: (0, k)),                # b1cat tile
                stream((tk, o_pad), lambda i, k: (k, 0)),            # w2flat tile
                const2d((E, o_pad)),                                 # b2flat
                stream((E, tk), lambda i, k: (0, k)),                # sel tile
            ],
            out_specs=[
                pl.BlockSpec((tn, o_pad), lambda i, k: (i, 0)),      # combined output
                pl.BlockSpec((tn, E), lambda i, k: (i, 0)),          # gates
            ],
            scratch_shapes=[
                pltpu.VMEM((tn, E), jnp.float32),                    # cached gates (per row tile)
                pltpu.VMEM((tn, o_pad), jnp.float32),                # output accumulator
            ],
        )
        return pl.pallas_call(
            _fusemoe_kernel,
            grid_spec=grid_spec,
            out_shape=(jax.ShapeDtypeStruct((n_pad, o_pad), jnp.float32),
                       jax.ShapeDtypeStruct((n_pad, E), jnp.float32)),
            compiler_params=pltpu.CompilerParams(
                dimension_semantics=("parallel", "arbitrary"),       # rows across TCs, E*H reduction
                vmem_limit_bytes=_vmem_limit_bytes()),
        )

    operands = (xc, wg1c, bg1f, wg2c, bg2f, w1cat, b1cat, w2flat, b2flat, sel)
    try:
        out_p, gates_p = build(True)(*operands)
    except Exception:
        # Fallback if this jax version rejects single-buffered (pl.Buffered(1)) specs.
        out_p, gates_p = build(False)(*operands)

    return out_p[:N, :O], gates_p[:N, :]


def init_params(key, input_size, hidden_size, output_size, num_experts):
    H2 = hidden_size // 2
    ks = jax.random.split(key, 8)
    s = 0.1
    wg1 = s * jax.random.normal(ks[0], (input_size, H2), jnp.float32)
    bg1 = s * jax.random.normal(ks[1], (1, H2), jnp.float32)
    wg2 = s * jax.random.normal(ks[2], (H2, num_experts), jnp.float32)
    bg2 = s * jax.random.normal(ks[3], (1, num_experts), jnp.float32)
    we1 = s * jax.random.normal(ks[4], (num_experts, input_size, hidden_size), jnp.float32)
    be1 = s * jax.random.normal(ks[5], (num_experts, 1, hidden_size), jnp.float32)
    we2 = s * jax.random.normal(ks[6], (num_experts, hidden_size, output_size), jnp.float32)
    be2 = s * jax.random.normal(ks[7], (num_experts, 1, output_size), jnp.float32)
    return (wg1, bg1, wg2, bg2, we1, be1, we2, be2)


def reference_forward(x, params):
    (wg1, bg1, wg2, bg2, we1, be1, we2, be2) = params
    h = jnp.maximum(x @ wg1 + bg1, 0.0)
    gates = jax.nn.softmax(h @ wg2 + bg2, axis=1)
    he = jnp.maximum(jnp.einsum('ni,eih->enh', x, we1) + be1, 0.0)
    ye = jnp.einsum('enh,eho->eno', he, we2) + be2                   # [E, N, O]
    out = jnp.sum(gates.T[:, :, None] * ye, axis=0)                  # [N, O]
    return out, gates


if __name__ == "__main__":
    # Small shapes consistent with the module's forward (tensor-input path).
    N, input_size, hidden_size, output_size, num_experts = 64, 32, 32, 16, 8

    key = jax.random.PRNGKey(0)
    kx, kp = jax.random.split(key)
    x = jax.random.normal(kx, (N, input_size), jnp.float32)
    params = init_params(kp, input_size, hidden_size, output_size, num_experts)

    out, gates = pygmo_fusemoe_forward(x, params)
    out = jax.block_until_ready(out)
    gates = jax.block_until_ready(gates)

    ref_out, ref_gates = reference_forward(x, params)
    assert out.shape == (N, output_size) and gates.shape == (N, num_experts)
    # bf16 MXU operands with f32 accumulation vs. f32 reference.
    assert jnp.allclose(out, ref_out, atol=2e-2, rtol=2e-2)
    assert jnp.allclose(gates, ref_gates, atol=2e-2, rtol=2e-2)

    print("KERNEL_OK")
</pallas_src>

<mosaic_0001>
module attributes {stable_mosaic.version = 11 : i64} {
  func.func @_fusemoe_kernel(%arg0: i32, %arg1: i32, %arg2: memref<32x32xbf16, #tpu.memory_space<vmem>>, %arg3: memref<32x16xbf16, #tpu.memory_space<vmem>>, %arg4: memref<1x16xf32, #tpu.memory_space<vmem>>, %arg5: memref<16x8xbf16, #tpu.memory_space<vmem>>, %arg6: memref<1x8xf32, #tpu.memory_space<vmem>>, %arg7: memref<32x256xbf16, #tpu.memory_space<vmem>>, %arg8: memref<1x256xf32, #tpu.memory_space<vmem>>, %arg9: memref<256x128xbf16, #tpu.memory_space<vmem>>, %arg10: memref<8x128xbf16, #tpu.memory_space<vmem>>, %arg11: memref<8x256xbf16, #tpu.memory_space<vmem>>, %arg12: memref<32x128xf32, #tpu.memory_space<vmem>>, %arg13: memref<32x8xf32, #tpu.memory_space<vmem>>, %arg14: memref<32x8xf32, #tpu.memory_space<vmem>>, %arg15: memref<32x128xf32, #tpu.memory_space<vmem>>) attributes {dimension_semantics = [#tpu.dimension_semantics<parallel>, #tpu.dimension_semantics<arbitrary>], iteration_bounds = array<i64: 2, 1>, scalar_prefetch = 0 : i64, scratch_operands = 2 : i64, tpu.core_type = #tpu.core_type<tc>, window_params = [{transform_indices = @transform_0, window_bounds = array<i64: 32, 32>}, {pipeline_mode = #tpu.pipeline_mode<synchronous>, transform_indices = @transform_1, window_bounds = array<i64: 32, 16>}, {pipeline_mode = #tpu.pipeline_mode<synchronous>, transform_indices = @transform_2, window_bounds = array<i64: 1, 16>}, {pipeline_mode = #tpu.pipeline_mode<synchronous>, transform_indices = @transform_3, window_bounds = array<i64: 16, 8>}, {pipeline_mode = #tpu.pipeline_mode<synchronous>, transform_indices = @transform_4, window_bounds = array<i64: 1, 8>}, {pipeline_mode = #tpu.pipeline_mode<synchronous>, transform_indices = @transform_5, window_bounds = array<i64: 32, 256>}, {pipeline_mode = #tpu.pipeline_mode<synchronous>, transform_indices = @transform_6, window_bounds = array<i64: 1, 256>}, {pipeline_mode = #tpu.pipeline_mode<synchronous>, transform_indices = @transform_7, window_bounds = array<i64: 256, 128>}, {pipeline_mode = #tpu.pipeline_mode<synchronous>, transform_indices = @transform_8, window_bounds = array<i64: 8, 128>}, {pipeline_mode = #tpu.pipeline_mode<synchronous>, transform_indices = @transform_9, window_bounds = array<i64: 8, 256>}, {transform_indices = @transform_10, window_bounds = array<i64: 32, 128>}, {transform_indices = @transform_11, window_bounds = array<i64: 32, 8>}]} {
    %c0 = arith.constant 0 : index
    %c0_0 = arith.constant 0 : index
    %0 = vector.load %arg2[%c0, %c0_0] : memref<32x32xbf16, #tpu.memory_space<vmem>>, vector<32x32xbf16>
    %c0_i32 = arith.constant 0 : i32
    %1 = arith.cmpi eq, %arg1, %c0_i32 : i32
    %2 = arith.extui %1 : i1 to i32
    %c0_i32_1 = arith.constant 0 : i32
    %3 = arith.cmpi ne, %2, %c0_i32_1 : i32
    scf.if %3 {
      %c0_21 = arith.constant 0 : index
      %c0_22 = arith.constant 0 : index
      %25 = vector.load %arg3[%c0_21, %c0_22] : memref<32x16xbf16, #tpu.memory_space<vmem>>, vector<32x16xbf16>
      %cst_23 = arith.constant dense<0.000000e+00> : vector<32x16xf32>
      %26 = tpu.matmul %0, %25, %cst_23 {dimension_numbers = #tpu.dot_dimension_numbers<[1], [0], [0], [1], [0, 0, 1, 1], [], []>} : vector<32x32xbf16>, vector<32x16xbf16>, vector<32x16xf32> -> vector<32x16xf32>
      %c0_24 = arith.constant 0 : index
      %c0_25 = arith.constant 0 : index
      %27 = vector.load %arg4[%c0_24, %c0_25] : memref<1x16xf32, #tpu.memory_space<vmem>>, vector<1x16xf32>
      %28 = vector.broadcast %27 : vector<1x16xf32> to vector<32x16xf32>
      %29 = arith.addf %26, %28 : vector<32x16xf32>
      %cst_26 = arith.constant 0.000000e+00 : f32
      %30 = vector.broadcast %cst_26 : f32 to vector<32x16xf32>
      %31 = arith.maximumf %29, %30 : vector<32x16xf32>
      %32 = arith.truncf %31 : vector<32x16xf32> to vector<32x16xbf16>
      %c0_27 = arith.constant 0 : index
      %c0_28 = arith.constant 0 : index
      %33 = vector.load %arg5[%c0_27, %c0_28] : memref<16x8xbf16, #tpu.memory_space<vmem>>, vector<16x8xbf16>
      %cst_29 = arith.constant dense<0.000000e+00> : vector<32x8xf32>
      %34 = tpu.matmul %32, %33, %cst_29 {dimension_numbers = #tpu.dot_dimension_numbers<[1], [0], [0], [1], [0, 0, 1, 1], [], []>} : vector<32x16xbf16>, vector<16x8xbf16>, vector<32x8xf32> -> vector<32x8xf32>
      %c0_30 = arith.constant 0 : index
      %c0_31 = arith.constant 0 : index
      %35 = vector.load %arg6[%c0_30, %c0_31] : memref<1x8xf32, #tpu.memory_space<vmem>>, vector<1x8xf32>
      %36 = vector.broadcast %35 : vector<1x8xf32> to vector<32x8xf32>
      %37 = arith.addf %34, %36 : vector<32x8xf32>
      %cst_32 = arith.constant dense<0xFF800000> : vector<32xf32>
      %38 = vector.multi_reduction <maximumf>, %37, %cst_32 [1] : vector<32x8xf32> to vector<32xf32>
      %39 = vector.shape_cast %38 : vector<32xf32> to vector<32x1xf32>
      %40 = vector.broadcast %39 : vector<32x1xf32> to vector<32x8xf32>
      %41 = arith.subf %37, %40 : vector<32x8xf32>
      %42 = math.exp %41 : vector<32x8xf32>
      %cst_33 = arith.constant dense<0.000000e+00> : vector<32xf32>
      %43 = vector.multi_reduction <add>, %42, %cst_33 [1] : vector<32x8xf32> to vector<32xf32>
      %44 = vector.shape_cast %43 : vector<32xf32> to vector<32x1xf32>
      %45 = vector.broadcast %44 : vector<32x1xf32> to vector<32x8xf32>
      %46 = arith.divf %42, %45 : vector<32x8xf32>
      %c0_34 = arith.constant 0 : index
      %c0_35 = arith.constant 0 : index
      %47 = vector.load %arg14[%c0_34, %c0_35] : memref<32x8xf32, #tpu.memory_space<vmem>>, vector<32x8xf32>
      tpu.vector_store %arg14[%c0_34, %c0_35], %46 {strides = array<i32>} : memref<32x8xf32, #tpu.memory_space<vmem>>, vector<32x8xf32>,
      %c0_36 = arith.constant 0 : index
      %c0_37 = arith.constant 0 : index
      %48 = vector.load %arg13[%c0_36, %c0_37] : memref<32x8xf32, #tpu.memory_space<vmem>>, vector<32x8xf32>
      tpu.vector_store %arg13[%c0_36, %c0_37], %46 {strides = array<i32>} : memref<32x8xf32, #tpu.memory_space<vmem>>, vector<32x8xf32>,
      %cst_38 = arith.constant 0.000000e+00 : f32
      %49 = vector.broadcast %cst_38 : f32 to vector<32x128xf32>
      %c0_39 = arith.constant 0 : index
      %c0_40 = arith.constant 0 : index
      %50 = vector.load %arg15[%c0_39, %c0_40] : memref<32x128xf32, #tpu.memory_space<vmem>>, vector<32x128xf32>
      tpu.vector_store %arg15[%c0_39, %c0_40], %49 {strides = array<i32>} : memref<32x128xf32, #tpu.memory_space<vmem>>, vector<32x128xf32>,
    } else {
    }
    %c0_2 = arith.constant 0 : index
    %c0_3 = arith.constant 0 : index
    %4 = vector.load %arg14[%c0_2, %c0_3] : memref<32x8xf32, #tpu.memory_space<vmem>>, vector<32x8xf32>
    %5 = arith.truncf %4 : vector<32x8xf32> to vector<32x8xbf16>
    %c0_4 = arith.constant 0 : index
    %c0_5 = arith.constant 0 : index
    %6 = vector.load %arg7[%c0_4, %c0_5] : memref<32x256xbf16, #tpu.memory_space<vmem>>, vector<32x256xbf16>
    %cst = arith.constant dense<0.000000e+00> : vector<32x256xf32>
    %7 = tpu.matmul %0, %6, %cst {dimension_numbers = #tpu.dot_dimension_numbers<[1], [0], [0], [1], [0, 0, 1, 1], [], []>} : vector<32x32xbf16>, vector<32x256xbf16>, vector<32x256xf32> -> vector<32x256xf32>
    %c0_6 = arith.constant 0 : index
    %c0_7 = arith.constant 0 : index
    %8 = vector.load %arg8[%c0_6, %c0_7] : memref<1x256xf32, #tpu.memory_space<vmem>>, vector<1x256xf32>
    %9 = vector.broadcast %8 : vector<1x256xf32> to vector<32x256xf32>
    %10 = arith.addf %7, %9 : vector<32x256xf32>
    %cst_8 = arith.constant 0.000000e+00 : f32
    %11 = vector.broadcast %cst_8 : f32 to vector<32x256xf32>
    %12 = arith.maximumf %10, %11 : vector<32x256xf32>
    %c0_9 = arith.constant 0 : index
    %c0_10 = arith.constant 0 : index
    %13 = vector.load %arg11[%c0_9, %c0_10] : memref<8x256xbf16, #tpu.memory_space<vmem>>, vector<8x256xbf16>
    %cst_11 = arith.constant dense<0.000000e+00> : vector<32x256xf32>
    %14 = tpu.matmul %5, %13, %cst_11 {dimension_numbers = #tpu.dot_dimension_numbers<[1], [0], [0], [1], [0, 0, 1, 1], [], []>} : vector<32x8xbf16>, vector<8x256xbf16>, vector<32x256xf32> -> vector<32x256xf32>
    %15 = arith.mulf %12, %14 : vector<32x256xf32>
    %16 = arith.truncf %15 : vector<32x256xf32> to vector<32x256xbf16>
    %c0_12 = arith.constant 0 : index
    %c0_13 = arith.constant 0 : index
    %17 = vector.load %arg15[%c0_12, %c0_13] : memref<32x128xf32, #tpu.memory_space<vmem>>, vector<32x128xf32>
    %c0_14 = arith.constant 0 : index
    %c0_15 = arith.constant 0 : index
    %18 = vector.load %arg9[%c0_14, %c0_15] : memref<256x128xbf16, #tpu.memory_space<vmem>>, vector<256x128xbf16>
    %cst_16 = arith.constant dense<0.000000e+00> : vector<32x128xf32>
    %19 = tpu.matmul %16, %18, %cst_16 {dimension_numbers = #tpu.dot_dimension_numbers<[1], [0], [0], [1], [0, 0, 1, 1], [], []>} : vector<32x256xbf16>, vector<256x128xbf16>, vector<32x128xf32> -> vector<32x128xf32>
    %20 = arith.addf %17, %19 : vector<32x128xf32>
    %c0_17 = arith.constant 0 : index
    %c0_18 = arith.constant 0 : index
    %21 = vector.load %arg15[%c0_17, %c0_18] : memref<32x128xf32, #tpu.memory_space<vmem>>, vector<32x128xf32>
    tpu.vector_store %arg15[%c0_17, %c0_18], %20 {strides = array<i32>} : memref<32x128xf32, #tpu.memory_space<vmem>>, vector<32x128xf32>,
    %c0_i32_19 = arith.constant 0 : i32
    %22 = arith.cmpi eq, %arg1, %c0_i32_19 : i32
    %23 = arith.extui %22 : i1 to i32
    %c0_i32_20 = arith.constant 0 : i32
    %24 = arith.cmpi ne, %23, %c0_i32_20 : i32
    scf.if %24 {
      %c0_21 = arith.constant 0 : index
      %c0_22 = arith.constant 0 : index
      %25 = vector.load %arg15[%c0_21, %c0_22] : memref<32x128xf32, #tpu.memory_space<vmem>>, vector<32x128xf32>
      %c0_23 = arith.constant 0 : index
      %c0_24 = arith.constant 0 : index
      %26 = vector.load %arg10[%c0_23, %c0_24] : memref<8x128xbf16, #tpu.memory_space<vmem>>, vector<8x128xbf16>
      %cst_25 = arith.constant dense<0.000000e+00> : vector<32x128xf32>
      %27 = tpu.matmul %5, %26, %cst_25 {dimension_numbers = #tpu.dot_dimension_numbers<[1], [0], [0], [1], [0, 0, 1, 1], [], []>} : vector<32x8xbf16>, vector<8x128xbf16>, vector<32x128xf32> -> vector<32x128xf32>
      %28 = arith.addf %25, %27 : vector<32x128xf32>
      %c0_26 = arith.constant 0 : index
      %c0_27 = arith.constant 0 : index
      %29 = vector.load %arg12[%c0_26, %c0_27] : memref<32x128xf32, #tpu.memory_space<vmem>>, vector<32x128xf32>
      tpu.vector_store %arg12[%c0_26, %c0_27], %28 {strides = array<i32>} : memref<32x128xf32, #tpu.memory_space<vmem>>, vector<32x128xf32>,
    } else {
    }
    return
  }
  func.func @transform_0(%arg0: i32, %arg1: i32) -> (i32, i32) {
    %c0_i32 = arith.constant 0 : i32
    %c0_i32_0 = arith.constant 0 : i32
    return %arg0, %c0_i32 : i32, i32
  }
  func.func @transform_1(%arg0: i32, %arg1: i32) -> (i32, i32) {
    %c0_i32 = arith.constant 0 : i32
    %c0_i32_0 = arith.constant 0 : i32
    %c0_i32_1 = arith.constant 0 : i32
    return %c0_i32, %c0_i32_0 : i32, i32
  }
  func.func @transform_2(%arg0: i32, %arg1: i32) -> (i32, i32) {
    %c0_i32 = arith.constant 0 : i32
    %c0_i32_0 = arith.constant 0 : i32
    %c0_i32_1 = arith.constant 0 : i32
    return %c0_i32, %c0_i32_0 : i32, i32
  }
  func.func @transform_3(%arg0: i32, %arg1: i32) -> (i32, i32) {
    %c0_i32 = arith.constant 0 : i32
    %c0_i32_0 = arith.constant 0 : i32
    %c0_i32_1 = arith.constant 0 : i32
    return %c0_i32, %c0_i32_0 : i32, i32
  }
  func.func @transform_4(%arg0: i32, %arg1: i32) -> (i32, i32) {
    %c0_i32 = arith.constant 0 : i32
    %c0_i32_0 = arith.constant 0 : i32
    %c0_i32_1 = arith.constant 0 : i32
    return %c0_i32, %c0_i32_0 : i32, i32
  }
  func.func @transform_5(%arg0: i32, %arg1: i32) -> (i32, i32) {
    %c0_i32 = arith.constant 0 : i32
    %c0_i32_0 = arith.constant 0 : i32
    return %c0_i32, %arg1 : i32, i32
  }
  func.func @transform_6(%arg0: i32, %arg1: i32) -> (i32, i32) {
    %c0_i32 = arith.constant 0 : i32
    %c0_i32_0 = arith.constant 0 : i32
    return %c0_i32, %arg1 : i32, i32
  }
  func.func @transform_7(%arg0: i32, %arg1: i32) -> (i32, i32) {
    %c0_i32 = arith.constant 0 : i32
    %c0_i32_0 = arith.constant 0 : i32
    return %arg1, %c0_i32 : i32, i32
  }
  func.func @transform_8(%arg0: i32, %arg1: i32) -> (i32, i32) {
    %c0_i32 = arith.constant 0 : i32
    %c0_i32_0 = arith.constant 0 : i32
    %c0_i32_1 = arith.constant 0 : i32
    return %c0_i32, %c0_i32_0 : i32, i32
  }
  func.func @transform_9(%arg0: i32, %arg1: i32) -> (i32, i32) {
    %c0_i32 = arith.constant 0 : i32
    %c0_i32_0 = arith.constant 0 : i32
    return %c0_i32, %arg1 : i32, i32
  }
  func.func @transform_10(%arg0: i32, %arg1: i32) -> (i32, i32) {
    %c0_i32 = arith.constant 0 : i32
    %c0_i32_0 = arith.constant 0 : i32
    return %arg0, %c0_i32 : i32, i32
  }
  func.func @transform_11(%arg0: i32, %arg1: i32) -> (i32, i32) {
    %c0_i32 = arith.constant 0 : i32
    %c0_i32_0 = arith.constant 0 : i32
    return %arg0, %c0_i32 : i32, i32
  }
}

module attributes {stable_mosaic.version = 11 : i64} {
  func.func @_fusemoe_kernel(%arg0: i32, %arg1: i32, %arg2: memref<32x32xbf16, #tpu.memory_space<vmem>>, %arg3: memref<32x16xbf16, #tpu.memory_space<vmem>>, %arg4: memref<1x16xf32, #tpu.memory_space<vmem>>, %arg5: memref<16x8xbf16, #tpu.memory_space<vmem>>, %arg6: memref<1x8xf32, #tpu.memory_space<vmem>>, %arg7: memref<32x256xbf16, #tpu.memory_space<vmem>>, %arg8: memref<1x256xf32, #tpu.memory_space<vmem>>, %arg9: memref<256x128xbf16, #tpu.memory_space<vmem>>, %arg10: memref<8x128xbf16, #tpu.memory_space<vmem>>, %arg11: memref<8x256xbf16, #tpu.memory_space<vmem>>, %arg12: memref<32x128xf32, #tpu.memory_space<vmem>>, %arg13: memref<32x8xf32, #tpu.memory_space<vmem>>, %arg14: memref<32x8xf32, #tpu.memory_space<vmem>>, %arg15: memref<32x128xf32, #tpu.memory_space<vmem>>) attributes {dimension_semantics = [#tpu.dimension_semantics<parallel>, #tpu.dimension_semantics<arbitrary>], iteration_bounds = array<i64: 2, 1>, scalar_prefetch = 0 : i64, scratch_operands = 2 : i64, tpu.core_type = #tpu.core_type<tc>, window_params = [{transform_indices = @transform_0, window_bounds = array<i64: 32, 32>}, {pipeline_mode = #tpu.pipeline_mode<synchronous>, transform_indices = @transform_1, window_bounds = array<i64: 32, 16>}, {pipeline_mode = #tpu.pipeline_mode<synchronous>, transform_indices = @transform_2, window_bounds = array<i64: 1, 16>}, {pipeline_mode = #tpu.pipeline_mode<synchronous>, transform_indices = @transform_3, window_bounds = array<i64: 16, 8>}, {pipeline_mode = #tpu.pipeline_mode<synchronous>, transform_indices = @transform_4, window_bounds = array<i64: 1, 8>}, {transform_indices = @transform_5, window_bounds = array<i64: 32, 256>}, {transform_indices = @transform_6, window_bounds = array<i64: 1, 256>}, {transform_indices = @transform_7, window_bounds = array<i64: 256, 128>}, {pipeline_mode = #tpu.pipeline_mode<synchronous>, transform_indices = @transform_8, window_bounds = array<i64: 8, 128>}, {transform_indices = @transform_9, window_bounds = array<i64: 8, 256>}, {transform_indices = @transform_10, window_bounds = array<i64: 32, 128>}, {transform_indices = @transform_11, window_bounds = array<i64: 32, 8>}]} {
    %c0 = arith.constant 0 : index
    %c0_0 = arith.constant 0 : index
    %0 = vector.load %arg2[%c0, %c0_0] : memref<32x32xbf16, #tpu.memory_space<vmem>>, vector<32x32xbf16>
    %c0_i32 = arith.constant 0 : i32
    %1 = arith.cmpi eq, %arg1, %c0_i32 : i32
    %2 = arith.extui %1 : i1 to i32
    %c0_i32_1 = arith.constant 0 : i32
    %3 = arith.cmpi ne, %2, %c0_i32_1 : i32
    scf.if %3 {
      %c0_21 = arith.constant 0 : index
      %c0_22 = arith.constant 0 : index
      %25 = vector.load %arg3[%c0_21, %c0_22] : memref<32x16xbf16, #tpu.memory_space<vmem>>, vector<32x16xbf16>
      %cst_23 = arith.constant dense<0.000000e+00> : vector<32x16xf32>
      %26 = tpu.matmul %0, %25, %cst_23 {dimension_numbers = #tpu.dot_dimension_numbers<[1], [0], [0], [1], [0, 0, 1, 1], [], []>} : vector<32x32xbf16>, vector<32x16xbf16>, vector<32x16xf32> -> vector<32x16xf32>
      %c0_24 = arith.constant 0 : index
      %c0_25 = arith.constant 0 : index
      %27 = vector.load %arg4[%c0_24, %c0_25] : memref<1x16xf32, #tpu.memory_space<vmem>>, vector<1x16xf32>
      %28 = vector.broadcast %27 : vector<1x16xf32> to vector<32x16xf32>
      %29 = arith.addf %26, %28 : vector<32x16xf32>
      %cst_26 = arith.constant 0.000000e+00 : f32
      %30 = vector.broadcast %cst_26 : f32 to vector<32x16xf32>
      %31 = arith.maximumf %29, %30 : vector<32x16xf32>
      %32 = arith.truncf %31 : vector<32x16xf32> to vector<32x16xbf16>
      %c0_27 = arith.constant 0 : index
      %c0_28 = arith.constant 0 : index
      %33 = vector.load %arg5[%c0_27, %c0_28] : memref<16x8xbf16, #tpu.memory_space<vmem>>, vector<16x8xbf16>
      %cst_29 = arith.constant dense<0.000000e+00> : vector<32x8xf32>
      %34 = tpu.matmul %32, %33, %cst_29 {dimension_numbers = #tpu.dot_dimension_numbers<[1], [0], [0], [1], [0, 0, 1, 1], [], []>} : vector<32x16xbf16>, vector<16x8xbf16>, vector<32x8xf32> -> vector<32x8xf32>
      %c0_30 = arith.constant 0 : index
      %c0_31 = arith.constant 0 : index
      %35 = vector.load %arg6[%c0_30, %c0_31] : memref<1x8xf32, #tpu.memory_space<vmem>>, vector<1x8xf32>
      %36 = vector.broadcast %35 : vector<1x8xf32> to vector<32x8xf32>
      %37 = arith.addf %34, %36 : vector<32x8xf32>
      %cst_32 = arith.constant dense<0xFF800000> : vector<32xf32>
      %38 = vector.multi_reduction <maximumf>, %37, %cst_32 [1] : vector<32x8xf32> to vector<32xf32>
      %39 = vector.shape_cast %38 : vector<32xf32> to vector<32x1xf32>
      %40 = vector.broadcast %39 : vector<32x1xf32> to vector<32x8xf32>
      %41 = arith.subf %37, %40 : vector<32x8xf32>
      %42 = math.exp %41 : vector<32x8xf32>
      %cst_33 = arith.constant dense<0.000000e+00> : vector<32xf32>
      %43 = vector.multi_reduction <add>, %42, %cst_33 [1] : vector<32x8xf32> to vector<32xf32>
      %44 = vector.shape_cast %43 : vector<32xf32> to vector<32x1xf32>
      %45 = vector.broadcast %44 : vector<32x1xf32> to vector<32x8xf32>
      %46 = arith.divf %42, %45 : vector<32x8xf32>
      %c0_34 = arith.constant 0 : index
      %c0_35 = arith.constant 0 : index
      %47 = vector.load %arg14[%c0_34, %c0_35] : memref<32x8xf32, #tpu.memory_space<vmem>>, vector<32x8xf32>
      tpu.vector_store %arg14[%c0_34, %c0_35], %46 {strides = array<i32>} : memref<32x8xf32, #tpu.memory_space<vmem>>, vector<32x8xf32>,
      %c0_36 = arith.constant 0 : index
      %c0_37 = arith.constant 0 : index
      %48 = vector.load %arg13[%c0_36, %c0_37] : memref<32x8xf32, #tpu.memory_space<vmem>>, vector<32x8xf32>
      tpu.vector_store %arg13[%c0_36, %c0_37], %46 {strides = array<i32>} : memref<32x8xf32, #tpu.memory_space<vmem>>, vector<32x8xf32>,
      %cst_38 = arith.constant 0.000000e+00 : f32
      %49 = vector.broadcast %cst_38 : f32 to vector<32x128xf32>
      %c0_39 = arith.constant 0 : index
      %c0_40 = arith.constant 0 : index
      %50 = vector.load %arg15[%c0_39, %c0_40] : memref<32x128xf32, #tpu.memory_space<vmem>>, vector<32x128xf32>
      tpu.vector_store %arg15[%c0_39, %c0_40], %49 {strides = array<i32>} : memref<32x128xf32, #tpu.memory_space<vmem>>, vector<32x128xf32>,
    } else {
    }
    %c0_2 = arith.constant 0 : index
    %c0_3 = arith.constant 0 : index
    %4 = vector.load %arg14[%c0_2, %c0_3] : memref<32x8xf32, #tpu.memory_space<vmem>>, vector<32x8xf32>
    %5 = arith.truncf %4 : vector<32x8xf32> to vector<32x8xbf16>
    %c0_4 = arith.constant 0 : index
    %c0_5 = arith.constant 0 : index
    %6 = vector.load %arg7[%c0_4, %c0_5] : memref<32x256xbf16, #tpu.memory_space<vmem>>, vector<32x256xbf16>
    %cst = arith.constant dense<0.000000e+00> : vector<32x256xf32>
    %7 = tpu.matmul %0, %6, %cst {dimension_numbers = #tpu.dot_dimension_numbers<[1], [0], [0], [1], [0, 0, 1, 1], [], []>} : vector<32x32xbf16>, vector<32x256xbf16>, vector<32x256xf32> -> vector<32x256xf32>
    %c0_6 = arith.constant 0 : index
    %c0_7 = arith.constant 0 : index
    %8 = vector.load %arg8[%c0_6, %c0_7] : memref<1x256xf32, #tpu.memory_space<vmem>>, vector<1x256xf32>
    %9 = vector.broadcast %8 : vector<1x256xf32> to vector<32x256xf32>
    %10 = arith.addf %7, %9 : vector<32x256xf32>
    %cst_8 = arith.constant 0.000000e+00 : f32
    %11 = vector.broadcast %cst_8 : f32 to vector<32x256xf32>
    %12 = arith.maximumf %10, %11 : vector<32x256xf32>
    %c0_9 = arith.constant 0 : index
    %c0_10 = arith.constant 0 : index
    %13 = vector.load %arg11[%c0_9, %c0_10] : memref<8x256xbf16, #tpu.memory_space<vmem>>, vector<8x256xbf16>
    %cst_11 = arith.constant dense<0.000000e+00> : vector<32x256xf32>
    %14 = tpu.matmul %5, %13, %cst_11 {dimension_numbers = #tpu.dot_dimension_numbers<[1], [0], [0], [1], [0, 0, 1, 1], [], []>} : vector<32x8xbf16>, vector<8x256xbf16>, vector<32x256xf32> -> vector<32x256xf32>
    %15 = arith.mulf %12, %14 : vector<32x256xf32>
    %16 = arith.truncf %15 : vector<32x256xf32> to vector<32x256xbf16>
    %c0_12 = arith.constant 0 : index
    %c0_13 = arith.constant 0 : index
    %17 = vector.load %arg15[%c0_12, %c0_13] : memref<32x128xf32, #tpu.memory_space<vmem>>, vector<32x128xf32>
    %c0_14 = arith.constant 0 : index
    %c0_15 = arith.constant 0 : index
    %18 = vector.load %arg9[%c0_14, %c0_15] : memref<256x128xbf16, #tpu.memory_space<vmem>>, vector<256x128xbf16>
    %cst_16 = arith.constant dense<0.000000e+00> : vector<32x128xf32>
    %19 = tpu.matmul %16, %18, %cst_16 {dimension_numbers = #tpu.dot_dimension_numbers<[1], [0], [0], [1], [0, 0, 1, 1], [], []>} : vector<32x256xbf16>, vector<256x128xbf16>, vector<32x128xf32> -> vector<32x128xf32>
    %20 = arith.addf %17, %19 : vector<32x128xf32>
    %c0_17 = arith.constant 0 : index
    %c0_18 = arith.constant 0 : index
    %21 = vector.load %arg15[%c0_17, %c0_18] : memref<32x128xf32, #tpu.memory_space<vmem>>, vector<32x128xf32>
    tpu.vector_store %arg15[%c0_17, %c0_18], %20 {strides = array<i32>} : memref<32x128xf32, #tpu.memory_space<vmem>>, vector<32x128xf32>,
    %c0_i32_19 = arith.constant 0 : i32
    %22 = arith.cmpi eq, %arg1, %c0_i32_19 : i32
    %23 = arith.extui %22 : i1 to i32
    %c0_i32_20 = arith.constant 0 : i32
    %24 = arith.cmpi ne, %23, %c0_i32_20 : i32
    scf.if %24 {
      %c0_21 = arith.constant 0 : index
      %c0_22 = arith.constant 0 : index
      %25 = vector.load %arg15[%c0_21, %c0_22] : memref<32x128xf32, #tpu.memory_space<vmem>>, vector<32x128xf32>
      %c0_23 = arith.constant 0 : index
      %c0_24 = arith.constant 0 : index
      %26 = vector.load %arg10[%c0_23, %c0_24] : memref<8x128xbf16, #tpu.memory_space<vmem>>, vector<8x128xbf16>
      %cst_25 = arith.constant dense<0.000000e+00> : vector<32x128xf32>
      %27 = tpu.matmul %5, %26, %cst_25 {dimension_numbers = #tpu.dot_dimension_numbers<[1], [0], [0], [1], [0, 0, 1, 1], [], []>} : vector<32x8xbf16>, vector<8x128xbf16>, vector<32x128xf32> -> vector<32x128xf32>
      %28 = arith.addf %25, %27 : vector<32x128xf32>
      %c0_26 = arith.constant 0 : index
      %c0_27 = arith.constant 0 : index
      %29 = vector.load %arg12[%c0_26, %c0_27] : memref<32x128xf32, #tpu.memory_space<vmem>>, vector<32x128xf32>
      tpu.vector_store %arg12[%c0_26, %c0_27], %28 {strides = array<i32>} : memref<32x128xf32, #tpu.memory_space<vmem>>, vector<32x128xf32>,
    } else {
    }
    return
  }
  func.func @transform_0(%arg0: i32, %arg1: i32) -> (i32, i32) {
    %c0_i32 = arith.constant 0 : i32
    %c0_i32_0 = arith.constant 0 : i32
    return %arg0, %c0_i32 : i32, i32
  }
  func.func @transform_1(%arg0: i32, %arg1: i32) -> (i32, i32) {
    %c0_i32 = arith.constant 0 : i32
    %c0_i32_0 = arith.constant 0 : i32
    %c0_i32_1 = arith.constant 0 : i32
    return %c0_i32, %c0_i32_0 : i32, i32
  }
  func.func @transform_2(%arg0: i32, %arg1: i32) -> (i32, i32) {
    %c0_i32 = arith.constant 0 : i32
    %c0_i32_0 = arith.constant 0 : i32
    %c0_i32_1 = arith.constant 0 : i32
    return %c0_i32, %c0_i32_0 : i32, i32
  }
  func.func @transform_3(%arg0: i32, %arg1: i32) -> (i32, i32) {
    %c0_i32 = arith.constant 0 : i32
    %c0_i32_0 = arith.constant 0 : i32
    %c0_i32_1 = arith.constant 0 : i32
    return %c0_i32, %c0_i32_0 : i32, i32
  }
  func.func @transform_4(%arg0: i32, %arg1: i32) -> (i32, i32) {
    %c0_i32 = arith.constant 0 : i32
    %c0_i32_0 = arith.constant 0 : i32
    %c0_i32_1 = arith.constant 0 : i32
    return %c0_i32, %c0_i32_0 : i32, i32
  }
  func.func @transform_5(%arg0: i32, %arg1: i32) -> (i32, i32) {
    %c0_i32 = arith.constant 0 : i32
    %c0_i32_0 = arith.constant 0 : i32
    return %c0_i32, %arg1 : i32, i32
  }
  func.func @transform_6(%arg0: i32, %arg1: i32) -> (i32, i32) {
    %c0_i32 = arith.constant 0 : i32
    %c0_i32_0 = arith.constant 0 : i32
    return %c0_i32, %arg1 : i32, i32
  }
  func.func @transform_7(%arg0: i32, %arg1: i32) -> (i32, i32) {
    %c0_i32 = arith.constant 0 : i32
    %c0_i32_0 = arith.constant 0 : i32
    return %arg1, %c0_i32 : i32, i32
  }
  func.func @transform_8(%arg0: i32, %arg1: i32) -> (i32, i32) {
    %c0_i32 = arith.constant 0 : i32
    %c0_i32_0 = arith.constant 0 : i32
    %c0_i32_1 = arith.constant 0 : i32
    return %c0_i32, %c0_i32_0 : i32, i32
  }
  func.func @transform_9(%arg0: i32, %arg1: i32) -> (i32, i32) {
    %c0_i32 = arith.constant 0 : i32
    %c0_i32_0 = arith.constant 0 : i32
    return %c0_i32, %arg1 : i32, i32
  }
  func.func @transform_10(%arg0: i32, %arg1: i32) -> (i32, i32) {
    %c0_i32 = arith.constant 0 : i32
    %c0_i32_0 = arith.constant 0 : i32
    return %arg0, %c0_i32 : i32, i32
  }
  func.func @transform_11(%arg0: i32, %arg1: i32) -> (i32, i32) {
    %c0_i32 = arith.constant 0 : i32
    %c0_i32_0 = arith.constant 0 : i32
    return %arg0, %c0_i32 : i32, i32
  }
}

</mosaic_0001>

<bundles_post_ra>
// kernel: tpu_custom_call.1
= control target key start
LH: loop header
LB: loop body
LE: loop exit
PB: predicated region body
PF: predicated region fallthrough
CT: control target
= control target key end

     0   :  { %17 = vsyncpa [#allocation5], 0  ;;  %s2033_s0 = inlined_call_operand.vmem [shape: bf16[64,32], index: 0, kind: input, shape index: {}]   ;;  %s2034_s1 = inlined_call_operand.vmem [shape: bf16[32,16], index: 1, kind: input, shape index: {}]   ;;  %s2035_s2 = inlined_call_operand.vmem [shape: f32[1,16], index: 2, kind: input, shape index: {}]   ;;  %s2036_s3 = inlined_call_operand.vmem [shape: bf16[16,8], index: 3, kind: input, shape index: {}]   ;;  %s2037_s4 = inlined_call_operand.vmem [shape: f32[1,8], index: 4, kind: input, shape index: {}]   ;;  %s2038_s5 = inlined_call_operand.vmem [shape: bf16[32,256], index: 5, kind: input, shape index: {}]   ;;  %s2039_s6 = inlined_call_operand.vmem [shape: f32[1,256], index: 6, kind: input, shape index: {}]   ;;  %s2040_s7 = inlined_call_operand.hbm [shape: bf16[256,128], index: 7, kind: input, shape index: {}]   ;;  %s2041_s8 = inlined_call_operand.vmem [shape: bf16[8,128], index: 8, kind: input, shape index: {}]   ;;  %s2042_s9 = inlined_call_operand.vmem [shape: bf16[8,256], index: 9, kind: input, shape index: {}]   ;;  %s2043_s10 = inlined_call_operand.hbm [shape: f32[64,128], index: 10, kind: output, shape index: {0}]   ;;  %s2044_s11 = inlined_call_operand.vmem [shape: f32[64,8], index: 11, kind: output, shape index: {1}]  }
   0x1   :  { %18 = vsyncpa [#allocation6], 0 }
   0x2   :  { %20 = vsyncpa [#allocation6 + $0x1], 0  ;;  %s1786_s17 = smov 0   ;;  %s1788_s18 = smov 0  }
   0x3   :  { %s1790_s19 = smov 0   ;;  %s1792_s20 = smov 0  }
   0x4   :  { %s1794_s21 = smov 0   ;;  %s1796_s22 = smov 0  }
   0x5 LB: > { %2051 = sst [smem:[#allocation10_spill]] %s1713_s21  ;;  %s1369_s23 = sadd.s32 4294967295, %s1717_s22   ;;  %s1717_s22 = sphi %s1796_s22, %s26_s22   ;;  %s1713_s21 = sphi %s1794_s21, %s2065_s21   ;;  %s1709_s20 = sphi %s1792_s20, %s2064_s20   ;;  %s1705_s19 = sphi %s1790_s19, %s2068_s19   ;;  %s1701_s18 = sphi %s1788_s18, %s2067_s18   ;;  %s1697_s17 = sphi %s1786_s17, %s2066_s17  }
   0x6   : > { %s1370_s24 = sadd.s32 4294967294, %s1717_s22   ;;  %s38_s25 = sadd.s32 1, %s1713_s21 }
   0x7   : > { %s280_s26 = sadd.s32 1, %s1705_s19  ;;  %p40_p0 = scmp.ge.s32.totalorder %s38_s25, 2 }
   0x8   : > { %p290_p1 = scmp.ne.s32.totalorder %s1705_s19, %s1701_s18  ;;  %p291_p2 = scmp.eq.s32.totalorder %s1369_s23, 1 }
   0x9   : > { %p296_p3 = scmp.ne.s32.totalorder %s1701_s18, %s1697_s17  ;;  %s2070_s25 = smov (%p40_p0, %s38_s25), 0 }
   0xa   : > { %2052 = sst [smem:[#allocation11_spill]] %s2070_s25  ;;  %p1826_p4 = por %p291_p2, %p290_p1 }
   0xb   : > { %p297_p5 = scmp.eq.s32.totalorder %s1370_s24, 1  ;;  %s277_s28 = ssub.s32 %s1713_s21, %s2070_s25 }
   0xc   : > { %s2053_s27 = scalar_select %p1826_p4, 1, 0 }
   0xd   : > { %p1371_p6 = scmp.ge.s32.totalorder %s1717_s22, 1  ;;  %p278_p7 = scmp.eq.s32.totalorder %s277_s28, 0 }
   0xe   : > { %p1833_p8 = por %p297_p5, %p296_p3  ;;  %p330_p9 = scmp.lt.s32.totalorder %s1717_s22, 3 }
   0xf   : > { %s1839_s30 = scalar_select %p278_p7, %s1705_s19, %s280_s26  }
  0x10   : > { %s2054_s29 = scalar_select %p1833_p8, 1, 0 }
  0x11   : > { %2055 = sst [smem:[#allocation12_spill]] %s1839_s30  ;;  %p1841_p10 = pnand %p1371_p6, %p330_p9 }
  0x12   : > { %p1845_p11 = scmp.eq.s32.totalorder %s1369_s23, 0  ;;  %s1719_s14 = smov [#allocation4]  }
  0x13   : > { %s2056_s12 = scalar_select %p1841_p10, 1, 0 }
  0x14   : > { %s2057_s13 = scalar_select %p1845_p11, 1, 0 }
  0x15   : > { %p1497_p12 = pneg %p1841_p10  ;;  %s374_s15 = sshll.u32 %s1719_s14, 4  ;;  %s375_s15 = int_to_ptr.vmem [resolvable:$true] %s374_s15 }
  0x16   : > { %s1607_s28 = scalar_lea.hbm %s2040_s7, 2048 }
  0x17   : > { %p1853_p13 = pnand %p1845_p11, %p1497_p12  ;;  %p1608_p0 = scmp.ne.s32.totalorder %s2040_s7, %s1607_s28 }
  0x18   : > { %p1614_p5 = scmp.lt.u32.totalorder %s1607_s28, %s2040_s7 }
  0x19   : > { %p1609_p1 = pneg %p1853_p13 }
  0x1b   : > { %p1610_p2 = pnand %p1609_p1, %p1608_p0 }
  0x1d   : > { %p1611_p3 = pneg %p1610_p2 }
  0x1f   : > { %p1616_p6 = pnand %p1614_p5, %p1611_p3 }
  0x21   : > { %1619 = shalt.err (!%p1616_p6)
}
  0x22   : > { %s1620_s30 = scalar_lea.vmem %s375_s15, 2048  ;;  %p1628_p8 = scmp.lt.s32.totalorder %s375_s15, %s375_s15 }
  0x23   : > { %p1621_p7 = scmp.ne.s32.totalorder %s375_s15, %s1620_s30  ;;  %p1629_p4 = scmp.lt.s32.totalorder %s1620_s30, %s1620_s30 }
  0x25   : > { %p1623_p9 = pnand %p1621_p7, %p1609_p1  ;;  %p1630_p11 = por %p1629_p4, %p1628_p8 }
  0x27   : > { %p1624_p12 = pneg %p1623_p9 }
  0x29   : > { %p1631_p10 = pnand %p1630_p11, %p1624_p12 }
  0x2b   : > { %1634 = shalt.err (!%p1631_p10)
}
  0x2c   : > { %s1720_s25 = smov 64   ;;  %s1721_s24 = smov 4  }
  0x2d   : > { %1500 = dma.hbm_to_vmem [thread:$0]  (!%p1853_p13), %s2040_s7, 2048, %s375_s15, [#allocation5], %s1720_s25, %s1720_s25, %s1721_s24  }
  0x2e   : > { %p2059_p0 = scmp.ne.s32.totalorder %s2056_s12, 0 }
  0x2f   : > { %p2060_p2 = scmp.ne.s32.totalorder (!%p2059_p0), %s2057_s13, 0 }
  0x30   : > { %411 = sbr.rel (%p2059_p0) target bundleno = 1292 (0x50c), region = 60 }
  0x37   : > { %1688 = dma.done.wait (%p2060_p2), [#allocation5], 2048  }
  0x38   : > { %1690 = vsyncadd (%p2060_p2), [#allocation5], 4294965248  ;;  %s1380_s21 = sshll.u32 %s1709_s20, 2  ;;  %v1562_v0 = vld [vmem:[%s2034_s1] sm:$0xff]   ;;  %v1563_v1 = vld [vmem:[%s2034_s1 + $0x8] sm:$0xff]   ;;  %vm543_vm0 = vcmask 261120  }
  0x39   : > { %p471_p4 = scmp.lt.s32.totalorder %s1380_s21, 7  ;;  %1470 = vmatprep.subr.bf16.mxu0 %v1562_v0  ;;  %v1566_v4 = vld [vmem:[%s2036_s3] sm:$0xff]   ;;  %vm620_vm1 = vcmask 130048   ;;  %vm676_vm2 = vcmask 64512   ;;  %v1570_v55 = vld [vmem:[%s2038_s5 + $0x14] ss:$8 sps:$4 sm:$0xff]  }
  0x3a   : > { %1471 = vmatpush3.bf16.msra.mxu0 %v1562_v0  ;;  %v1384_v5 = vld [vmem:[%s2035_s2] ss:$0 sm:$0xff]  ;;  %v1567_v53 = vld [vmem:[%s2038_s5 + $0x4] ss:$8 sps:$4 sm:$0xff]   ;;  %v1572_v56 = vld [vmem:[%s2038_s5 + $0x10] ss:$8 sps:$4 sm:$0xff]  }
  0x3b   : > { %s2072_s21 = smov (!%p471_p4, %s1380_s21), 7  ;;  %1472 = vmatprep.subr.bf16.mxu0 %v1563_v1  ;;  %v1391_v20 = vld [vmem:[%s2037_s4] ss:$0 sm:$0xff]  ;;  %792 = vmatprep.subr.bf16.mxu1 %v1567_v53  ;;  %v1722_v57 = vmov 0   ;;  %vm866_vm3 = vcmask 1043456   ;;  %s460_s26 = sand.u32 1, %s1701_s18  }
  0x3c   : > { %s1381_s30 = sshll.u32 %s2072_s21, 2  ;;  %v1569_v54 = vld [vmem:[%s2038_s5] ss:$8 sps:$4 sm:$0xff]   ;;  %824 = vmatprep.mubr.bf16.mxu1 %v1722_v57  ;;  %s1383_s14 = sshll.u32 %s2072_s21, 3 }
  0x3d   : > { %s474_s15 = scalar_lea.vmem %s2033_s0, %s1381_s30  ;;  %793 = vmatpush1.bf16.msra.mxu1 %v1569_v54  ;;  %v853_v58 = vld [vmem:[%s2042_s9] sm:$0xff]  ;;  %s499_s24 = scalar_lea.vmem %s2044_s11, %s1383_s14 }
  0x3e   : > { %v1892_v2 = vld [vmem:[%s474_s15] sm:$0xff]   ;;  %v1896_v3 = vld [vmem:[%s474_s15 + $0x8] sm:$0xff]   ;;  %1473 = vmatpush3.bf16.msra.mxu0 %v1563_v1  ;;  %794 = vmatprep.subr.bf16.mxu1 %v1570_v55  ;;  %v1404_v59 = vcombine.high %v853_v58, %v853_v58  ;;  %v1403_v60 = vcombine.low %v853_v58, %v853_v58  ;;  %s1379_s23 = sshll.u32 %s460_s26, 5  ;;  %s1431_s28 = sshll.u32 %s1709_s20, 9 }
  0x3f   : > { %1474 = vmatprep.mubr.msk.bf16.mxu0 %vm543_vm0, %v1892_v2  ;;  %1478 = vmatprep.subr.bf16.mxu0 %v1566_v4  ;;  %v1134_v62 = vld [vmem:[%s2041_s8] sm:$0xf]  ;;  %s462_s30 = scalar_lea.vmem [#allocation7], %s1379_s23  ;;  %s1985_s12 = scalar_lea.hbm %s2043_s10, %s1431_s28 }
  0x40   : > { %v868_v61 = vsel %vm866_vm3, %v1403_v60, 0  ;;  %v1136_v63 = vsel %vm866_vm3, %v1134_v62, 0  ;;  %v1575_v0 = vld [vmem:[#allocation4 + $0x40] sm:$0xff]   ;;  %s1214_s16 = sshll.u32 %s462_s30, 4  ;;  %s1987_s25 = scalar_lea.sflag [#allocation6], %s460_s26  ;;  %s1980_s16 = int_to_ptr.vmem [resolvable:$true] %s1214_s16 }
  0x41   : > { %1475 = vmatmul.mubr.msk.bf16.vlgmr.msra.gmra.mrb[0].mxu0 %vm543_vm0, %v1896_v3  ;;  %795 = vmatpush1.bf16.msra.mxu1 %v1572_v56  ;;  %v1576_v1 = vld [vmem:[#allocation4] sm:$0xff]   ;;  %p2061_p10 = scmp.ne.s32.totalorder %s2053_s27, 0  ;;  %s1723_s20 = smov [#allocation7]  }
  0x42   : > { %1479 = vmatpush3.bf16.msra.mxu0 %v1566_v4  ;;  %v1577_v4 = vld [vmem:[#allocation4 + $0x48] sm:$0xff]   ;;  %1439 = vmatprep.subr.bf16.mxu1 %v1575_v0  ;;  %s1639_s21 = sshll.u32 %s1723_s20, 4  ;;  %s1640_s21 = int_to_ptr.vmem [resolvable:$false] %s1639_s21 }
  0x43   : > { %1405 = vmatprep.subr.msk.bf16.mxu0 %vm866_vm3, %v1404_v59  ;;  %s1641_s13 = scalar_lea.vmem %s1640_s21, 1024  ;;  %p1642_p1 = scmp.lt.s32.totalorder %s1980_s16, %s1640_s21 }
  0x44   : > { %1401 = vmatmul.mubr.msk.bf16.vlgmr.msra.gmra.mrb[0].mxu1 %vm543_vm0, %v1892_v2  ;;  %v1578_v2 = vld [vmem:[#allocation4 + $0x8] sm:$0xff]  }
  0x45   : > { %834 = vmatprep.mubr.bf16.mxu1 %v1722_v57  ;;  %1440 = vmatpush3.bf16.msra.mxu1 %v1576_v1 }
  0x46   : > { %1441 = vmatprep.subr.bf16.mxu1 %v1577_v4 }
  0x49   : > { %1442 = vmatpush3.bf16.msra.mxu1 %v1578_v2 }
  0x4c   : > { %1402 = vmatmul.mubr.msk.bf16.gmra.mrb[4].mxu1 %vm543_vm0, %v1896_v3  ;;  %v1582_v3 = vld [vmem:[#allocation4 + $0x18] sm:$0xff]  }
 0x114   : > { %v1476_v6 = vpop.f32.mrb[0].mxu0 }
 0x115   : > { %v593_v7 = vadd.f32 %v1476_v6, %v1384_v5  ;;  %v584_v8 = vpop.f32.mrb[1].mxu0  ;;  %v1580_v6 = vld [vmem:[#allocation4 + $0x10] sm:$0xff]  }
 0x116   : > { %v585_v9 = vadd.f32 %v1384_v5, %v584_v8  ;;  %v1477_v10 = vpop.f32.mrb[2].mxu0  ;;  %v1583_v8 = vld [vmem:[#allocation4 + $0x60] sm:$0xff]  }
 0x117   : > { %v596_v11 = vadd.f32 %v1477_v10, %v1384_v5  ;;  %v587_v12 = vpop.f32.mrb[3].mxu0  ;;  %v601_v14 = vmax.f32 %v593_v7, 0.0  ;;  %v1581_v7 = vld [vmem:[#allocation4 + $0x58] sm:$0xff]   ;;  %v1585_v10 = vld [vmem:[#allocation4 + $0x68] sm:$0xff]  }
 0x118   : > { %v588_v13 = vadd.f32 %v1384_v5, %v587_v12  ;;  %v599_v16 = vmax.f32 %v585_v9, 0.0  ;;  %v1579_v5 = vld [vmem:[#allocation4 + $0x50] sm:$0xff]   ;;  %v1584_v9 = vld [vmem:[#allocation4 + $0x20] sm:$0xff]  }
 0x119   : > { %v602_v15 = vmax.f32 %v596_v11, 0.0  ;;  %1443 = vmatprep.subr.bf16.mxu1 %v1579_v5  ;;  %v1586_v11 = vld [vmem:[#allocation4 + $0x28] sm:$0xff]  }
 0x11a   : > { %v600_v17 = vmax.f32 %v588_v13, 0.0  ;;  %1444 = vmatpush3.bf16.msra.mxu1 %v1580_v6 }
 0x11b   : > { %v604_v18 = vpack.c.bf16 %v602_v15, %v601_v14  ;;  %1445 = vmatprep.subr.bf16.mxu1 %v1581_v7 }
 0x11c   : > { %v603_v19 = vpack.c.bf16 %v600_v17, %v599_v16 }
 0x11e   : > { %1480 = vmatprep.mubr.msk.bf16.mxu0 %vm620_vm1, %v603_v19  ;;  %1446 = vmatpush3.bf16.msra.mxu1 %v1582_v3 }
 0x11f   : > { %1481 = vmatmul.mubr.msk.bf16.vlgmr.msra.gmra.mrb[4].mxu0 %vm620_vm1, %v604_v18  ;;  %1447 = vmatprep.subr.bf16.mxu1 %v1583_v8 }
 0x120   : > { %905 = vmatprep.mubr.bf16.mxu0 %v1722_v57  ;;  %874 = vmatpush1.bf16.msra.mxu0 %v868_v61 }
 0x121   : > { %1490 = vmatprep.subr.msk.bf16.mxu0 %vm866_vm3, %v1134_v62 }
 0x122   : > { %1448 = vmatpush3.bf16.msra.mxu1 %v1584_v9 }
 0x123   : > { %1449 = vmatprep.subr.bf16.mxu1 %v1585_v10 }
 0x126   : > { %1450 = vmatpush3.bf16.msra.mxu1 %v1586_v11 }
 0x1f2   : > { %v1482_v21 = vpop.f32.mrb[4].mxu0 }
 0x1f3   : > { %v670_v22 = vadd.f32 %v1482_v21, %v1391_v20  ;;  %v661_v23 = vpop.f32.mrb[5].mxu0 }
 0x1f4   : > { %v662_v24 = vadd.f32 %v1391_v20, %v661_v23  ;;  %v1483_v25 = vpop.f32.mrb[6].mxu0 }
 0x1f5   : > { %v673_v26 = vadd.f32 %v1483_v25, %v1391_v20  ;;  %v664_v27 = vpop.f32.mrb[7].mxu0  ;;  %v683_v28 = vsel %vm676_vm2, %v670_v22, -inf }
 0x1f6   : > { %v665_v29 = vadd.f32 %v1391_v20, %v664_v27  ;;  %684 = vmax.xlane.f32.xlu1 %v683_v28  ;;  %v677_v30 = vsel %vm676_vm2, %v662_v24, -inf }
 0x1f7   : > { %678 = vmax.xlane.f32.xlu0 %v677_v30  ;;  %v686_v31 = vsel %vm676_vm2, %v673_v26, -inf  ;;  %v826_v30 = vpop.f32.mrb[0].mxu1 }
 0x1f8   : > { %v680_v32 = vsel %vm676_vm2, %v665_v29, -inf }
 0x1fa   : > { %687 = vmax.xlane.f32.xlu1 %v686_v31  ;;  %v828_v31 = vpop.f32.mrb[1].mxu1 }
 0x1fb   : > { %681 = vmax.xlane.f32.xlu0 %v680_v32  ;;  %v830_v32 = vpop.f32.mrb[2].mxu1 }
 0x283   : > { %v685_v33 = vpop.xlane.xlu1 %684 }
 0x284   : > { %v691_v34 = vsub.f32 %v670_v22, %v685_v33  ;;  %v679_v35 = vpop.xlane.xlu0 %678  ;;  %v832_v33 = vpop.f32.mrb[3].mxu1 }
 0x285   : > { %v689_v36 = vsub.f32 %v662_v24, %v679_v35  ;;  %v1588_v35 = vld [vmem:[#allocation4 + $0x30] sm:$0xff]  }
 0x286   : > { %v697_v37 = vmul.f32 1.442695, %v691_v34  ;;  %v1587_v34 = vld [vmem:[#allocation4 + $0x70] sm:$0xff]  }
 0x287   : > { %v693_v38 = vmul.f32 1.442695, %v689_v36  ;;  %v688_v39 = vpop.xlane.xlu1 %687  ;;  %v836_v36 = vpop.f32.mrb[4].mxu1  ;;  %1451 = vmatprep.subr.bf16.mxu1 %v1587_v34 }
 0x288   : > { %v692_v40 = vsub.f32 %v673_v26, %v688_v39  ;;  %v682_v41 = vpop.xlane.xlu0 %681  ;;  %1452 = vmatpush3.bf16.msra.mxu1 %v1588_v35  ;;  %v1589_v39 = vld [vmem:[#allocation4 + $0x78] sm:$0xff]  }
 0x289   : > { %1591 = vpow2.f32 %v693_v38  ;;  %v690_v42 = vsub.f32 %v665_v29, %v682_v41  ;;  %v1590_v41 = vld [vmem:[#allocation4 + $0x38] sm:$0xff]   ;;  %1453 = vmatprep.subr.bf16.mxu1 %v1589_v39 }
 0x28a   : > { %1593 = vpow2.f32 %v697_v37  ;;  %v699_v43 = vmul.f32 1.442695, %v692_v40  ;;  %v838_v37 = vpop.f32.mrb[5].mxu1 }
 0x28b   : > { %v695_v44 = vmul.f32 1.442695, %v690_v42  ;;  %v840_v38 = vpop.f32.mrb[6].mxu1  ;;  %v745_v42 = vlaneseq }
 0x28c   : > { %v842_v40 = vpop.f32.mrb[7].mxu1  ;;  %1454 = vmatpush3.bf16.msra.mxu1 %v1590_v41 }
 0x28d   : > { %1595 = vpow2.f32 %v695_v44 }
 0x28e   : > { %1597 = vpow2.f32 %v699_v43  ;;  %v746_v43 = vshrl.u32 %v745_v42, 7 }
 0x290   : > { %v747_v44 = vsub.s32 0, %v746_v43 }
 0x293   : > { %v1913_v45 = vpop.eup %1591 }
 0x294   : > { %v701_v46 = vsel %vm676_vm2, %v1913_v45, 0.0  ;;  %v1917_v47 = vpop.eup %1593 }
 0x295   : > { %702 = vadd.xlane.f32.xlu0 %v701_v46  ;;  %v707_v49 = vsel %vm676_vm2, %v1917_v47, 0.0  ;;  %v751_v46 = vsub.s32 1, %v746_v43 }
 0x297   : > { %v1919_v48 = vpop.eup %1595 }
 0x298   : > { %v704_v50 = vsel %vm676_vm2, %v1919_v48, 0.0  ;;  %v1925_v51 = vpop.eup %1597 }
 0x299   : > { %708 = vadd.xlane.f32.xlu0 %v707_v49  ;;  %705 = vadd.xlane.f32.xlu1 %v704_v50  ;;  %v710_v52 = vsel %vm676_vm2, %v1925_v51, 0.0 }
 0x29d   : > { %711 = vadd.xlane.f32.xlu1 %v710_v52 }
 0x322   : > { %v703_v12 = vpop.xlane.xlu0 %702 }
 0x323   : > { %1599 = vrcp.f32 %v703_v12 }
 0x326   : > { %v706_v13 = vpop.xlane.xlu1 %705  ;;  %v709_v14 = vpop.xlane.xlu0 %708 }
 0x327   : > { %1601 = vrcp.f32 %v706_v13 }
 0x328   : > { %1603 = vrcp.f32 %v709_v14 }
 0x32a   : > { %v712_v15 = vpop.xlane.xlu1 %711 }
 0x32b   : > { %1605 = vrcp.f32 %v712_v15 }
 0x32d   : > { %v1600_v16 = vpop.eup %1599 }
 0x32e   : > { %v714_v17 = vmul.f32 %v1600_v16, %v1913_v45  ;;  %v743_v45 = vld [vmem:[%s2039_s6] sm:$0x3] }
 0x330   : > { %721 = vst.msk [vmem:[#allocation2] sm:$0xff] %vm676_vm2, %v714_v17  ;;  %725 = vst.msk [vmem:[%s499_s24] sm:$0xff] %vm676_vm2, %v714_v17 }
 0x331   : > { %v1602_v18 = vpop.eup %1601 }
 0x332   : > { %v1604_v19 = vpop.eup %1603  ;;  %v716_v20 = vmul.f32 %v1602_v18, %v1919_v48  ;;  %v752_v48 = vrot.slane %v743_v45, %v751_v46 }
 0x333   : > { %v718_v21 = vmul.f32 %v1604_v19, %v1917_v47  ;;  %v748_v47 = vrot.slane %v743_v45, %v747_v44 }
 0x334   : > { %722 = vst.msk [vmem:[#allocation2 + $0x8] sm:$0xff] %vm676_vm2, %v716_v20  ;;  %726 = vst.msk [vmem:[%s499_s24 + $0x8] sm:$0xff] %vm676_vm2, %v716_v20  ;;  %v829_v50 = vadd.f32 %v828_v31, %v752_v48  ;;  %v833_v54 = vadd.f32 %v832_v33, %v752_v48  ;;  %v839_v62 = vadd.f32 %v838_v37, %v752_v48 }
 0x335   : > { %v1606_v22 = vpop.eup %1605  ;;  %723 = vst.msk [vmem:[#allocation2 + $0x10] sm:$0xff] %vm676_vm2, %v718_v21  ;;  %727 = vst.msk [vmem:[%s499_s24 + $0x10] sm:$0xff] %vm676_vm2, %v718_v21  ;;  %v827_v49 = vadd.f32 %v826_v30, %v748_v47  ;;  %v831_v52 = vadd.f32 %v830_v32, %v748_v47  ;;  %v837_v58 = vadd.f32 %v836_v36, %v748_v47 }
 0x336   : > { %v720_v23 = vmul.f32 %v1606_v22, %v1925_v51  ;;  %v846_v53 = vmax.f32 %v829_v50, 0.0  ;;  %v848_v60 = vmax.f32 %v833_v54, 0.0  ;;  %v841_v6 = vadd.f32 %v840_v38, %v748_v47 }
 0x337   : > { %v733_v24 = vld [vmem:[#allocation2] sm:$0xff]  ;;  %v845_v51 = vmax.f32 %v827_v49, 0.0  ;;  %v847_v56 = vmax.f32 %v831_v52, 0.0  ;;  %v849_v2 = vmax.f32 %v837_v58, 0.0  ;;  %v850_v7 = vmax.f32 %v839_v62, 0.0 }
 0x338   : > { %724 = vst.msk [vmem:[#allocation2 + $0x18] sm:$0xff] %vm676_vm2, %v720_v23  ;;  %728 = vst.msk [vmem:[%s499_s24 + $0x18] sm:$0xff] %vm676_vm2, %v720_v23  ;;  %v843_v8 = vadd.f32 %v842_v40, %v752_v48  ;;  %v851_v10 = vmax.f32 %v841_v6, 0.0  ;;  %s1635_s24 = scalar_lea.vmem %s1980_s16, 512 }
 0x339   : > { %p1636_p8 = scmp.ne.s32.totalorder %s1980_s16, %s1635_s24  ;;  %p1643_p3 = scmp.lt.s32.totalorder %s1641_s13, %s1635_s24 }
 0x33a   : > { %v852_v13 = vmax.f32 %v843_v8, 0.0 }
 0x33b   : > { %v734_v25 = vld [vmem:[#allocation2 + $0x8] sm:$0xff]  ;;  %p1637_p11 = pnand %p1636_p8, %p2061_p10  ;;  %p1644_p5 = por %p1643_p3, %p1642_p1 }
 0x33c   : > { %v737_v26 = vpack.c.bf16 %v734_v25, %v733_v24  ;;  %v735_v28 = vld [vmem:[#allocation2 + $0x10] sm:$0xff] }
 0x33d   : > { %p1638_p13 = pneg %p1637_p11 }
 0x33e   : > { %1406 = vmatmul.mubr.msk.bf16.vlgmr.msra.gmra.mrb[8].mxu0 %vm676_vm2, %v737_v26 }
 0x33f   : > { %915 = vmatprep.mubr.bf16.mxu0 %v1722_v57  ;;  %1485 = vmatpush3.bf16.msra.mxu0 %v1136_v63  ;;  %v736_v27 = vld [vmem:[#allocation2 + $0x18] sm:$0xff]  ;;  %p1645_p6 = pnand %p1644_p5, %p1638_p13 }
 0x340   : > { %v738_v29 = vpack.c.bf16 %v736_v27, %v735_v28 }
 0x346   : > { %1407 = vmatmul.mubr.msk.bf16.gmra.mrb[12].mxu0 %vm676_vm2, %v738_v29 }
 0x347   : > { %1486 = vmatprep.mubr.msk.bf16.mxu0 %vm676_vm2, %v737_v26 }
 0x34e   : > { %1487 = vmatmul.mubr.msk.bf16.vlgmr.msra.gmra.mrb[16].mxu0 %vm676_vm2, %v738_v29 }
 0x411   : > { %v907_v55 = vpop.f32.mrb[8].mxu0 }
 0x412   : > { %v926_v57 = vmul.f32 %v907_v55, %v845_v51  ;;  %v909_v59 = vpop.f32.mrb[9].mxu0 }
 0x413   : > { %v927_v61 = vmul.f32 %v909_v59, %v846_v53  ;;  %v911_v63 = vpop.f32.mrb[10].mxu0 }
 0x414   : > { %v928_v0 = vmul.f32 %v911_v63, %v847_v56  ;;  %v913_v1 = vpop.f32.mrb[11].mxu0 }
 0x415   : > { %v929_v4 = vmul.f32 %v913_v1, %v848_v60 }
 0x416   : > { %v934_v5 = vpack.c.bf16 %v928_v0, %v926_v57 }
 0x417   : > { %v935_v3 = vpack.c.bf16 %v929_v4, %v927_v61 }
 0x419   : > { %v917_v9 = vpop.f32.mrb[12].mxu0  ;;  %1102 = vmatprep.mubr.bf16.mxu1 %v935_v3 }
 0x41a   : > { %v930_v11 = vmul.f32 %v917_v9, %v849_v2  ;;  %v919_v12 = vpop.f32.mrb[13].mxu0  ;;  %1103 = vmatmul.mubr.bf16.vlgmr.msra.gmra.mrb[8].mxu1 %v934_v5 }
 0x41b   : > { %v931_v14 = vmul.f32 %v919_v12, %v850_v7  ;;  %v921_v15 = vpop.f32.mrb[14].mxu0 }
 0x41c   : > { %v932_v16 = vmul.f32 %v921_v15, %v851_v10  ;;  %v923_v17 = vpop.f32.mrb[15].mxu0 }
 0x41d   : > { %v933_v18 = vmul.f32 %v923_v17, %v852_v13 }
 0x41e   : > { %v936_v19 = vpack.c.bf16 %v932_v16, %v930_v11 }
 0x41f   : > { %v937_v20 = vpack.c.bf16 %v933_v18, %v931_v14 }
 0x421   : > { %1110 = vmatprep.mubr.bf16.mxu1 %v937_v20  ;;  %v1488_v21 = vpop.f32.mrb[16].mxu0 }
 0x422   : > { %1111 = vmatmul.mubr.bf16.gmra.mrb[12].mxu1 %v936_v19  ;;  %v1172_v22 = vpop.f32.mrb[17].mxu0 }
 0x423   : > { %v1489_v23 = vpop.f32.mrb[18].mxu0 }
 0x424   : > { %v1175_v24 = vpop.f32.mrb[19].mxu0 }
 0x4ed   : > { %v1455_v25 = vpop.f32.mrb[8].mxu1 }
 0x4ee   : > { %v1456_v26 = vpop.f32.mrb[9].mxu1 }
 0x4ef   : > { %v1457_v27 = vadd.f32 %v1456_v26, %v1455_v25  ;;  %v1458_v28 = vpop.f32.mrb[10].mxu1 }
 0x4f0   : > { %v1459_v29 = vpop.f32.mrb[11].mxu1 }
 0x4f1   : > { %v1187_v30 = vadd.f32 %v1457_v27, %v1172_v22  ;;  %v1460_v31 = vadd.f32 %v1459_v29, %v1458_v28 }
 0x4f3   : > { %1191 = vst [vmem:[%s462_s30] sm:$0xff] %v1187_v30  ;;  %v1188_v32 = vadd.f32 %v1460_v31, %v1175_v24 }
 0x4f5   : > { %1192 = vst [vmem:[%s462_s30 + $0x8] sm:$0xff] %v1188_v32  ;;  %v1461_v33 = vpop.f32.mrb[12].mxu1 }
 0x4f6   : > { %v1462_v34 = vpop.f32.mrb[13].mxu1 }
 0x4f7   : > { %v1463_v35 = vadd.f32 %v1462_v34, %v1461_v33  ;;  %v1464_v36 = vpop.f32.mrb[14].mxu1 }
 0x4f8   : > { %v1465_v37 = vpop.f32.mrb[15].mxu1 }
 0x4f9   : > { %v1189_v38 = vadd.f32 %v1488_v21, %v1463_v35  ;;  %v1466_v39 = vadd.f32 %v1465_v37, %v1464_v36 }
 0x4fb   : > { %1193 = vst [vmem:[%s462_s30 + $0x10] sm:$0xff] %v1189_v38  ;;  %v1190_v40 = vadd.f32 %v1489_v23, %v1466_v39 }
 0x4fd   : > { %1194 = vst [vmem:[%s462_s30 + $0x18] sm:$0xff] %v1190_v40 }
 0x4fe   : > { %1648 = shalt.err (!%p1645_p6)
}
 0x4ff   : > { %s1649_s26 = scalar_lea.hbm %s1985_s12, 512  ;;  %s1653_s28 = scalar_lea.hbm %s2043_s10, 1024 }
 0x500   : > { %p1650_p7 = scmp.ne.s32.totalorder %s1985_s12, %s1649_s26  ;;  %p1654_p0 = scmp.lt.u32.totalorder %s1985_s12, %s2043_s10 }
 0x501   : > { %p1655_p2 = scmp.lt.u32.totalorder %s1653_s28, %s1649_s26  ;;  %p1657_p8 = scmp.lt.u32.totalorder %s1649_s26, %s1985_s12 }
 0x502   : > { %p1651_p9 = pnand %p1650_p7, %p2061_p10 }
 0x503   : > { %p1656_p4 = por %p1655_p2, %p1654_p0 }
 0x504   : > { %p1652_p12 = pneg %p1651_p9 }
 0x505   : > { %p1658_p11 = por %p1657_p8, %p1656_p4 }
 0x507   : > { %p1659_p13 = pnand %p1658_p11, %p1652_p12 }
 0x509   : > { %1662 = shalt.err (!%p1659_p13)
}
 0x50a   : > { %s1724_s24 = smov 128   ;;  %s1725_s20 = smov 8  }
 0x50b   : > { %1495 = dma.vmem_to_hbm [thread:$0]  (%p2061_p10), %s1980_s16, 512, %s1985_s12, %s1987_s25, %s1724_s24, %s1724_s24, %s1725_s20  }
 0x50c PF: > { %p1507_p1 = scmp.ge.s32.totalorder %s1717_s22, 2  ;;  %s1233_s21 = sand.u32 1, %s1697_s17  }
 0x50d   : > { %p2062_p3 = scmp.ne.s32.totalorder %s2054_s29, 0  ;;  %s1234_s13 = scalar_lea.sflag [#allocation6], %s1233_s21 }
 0x50f   : > { %p1502_p5 = pnand %p1507_p1, %p2062_p3 }
 0x511   : > { %1692 = dma.done.wait (!%p1502_p5), %s1234_s13, 512  }
 0x512   : > { %1694 = vsyncadd (!%p1502_p5), %s1234_s13, 4294966784  ;;  %s26_s22 = sadd.s32 1, %s1717_s22   ;;  %s2063_s26 = sld [smem:[#allocation12_spill]] }
 0x513   : > { %p23_p6 = scmp.ge.s32.totalorder %s26_s22, 4   ;;  %s2064_s20 = sld [smem:[#allocation10_spill]] }
 0x514   : > { %s2065_s21 = sld [smem:[#allocation11_spill]]  ;;  %s2066_s17 = smov %s1701_s18 }
 0x515   : > { %s2067_s18 = smov %s1705_s19  ;;  %25 = sbr.rel (!%p23_p6) target bundleno = 5 (0x5), region = 130 }
 0x518   : > { %s2068_s19 = smov %s2063_s26 }
 0x51c   :  { %1247 = vsyncpa [#allocation5], 1 }
 0x51d   :  { %1249 = vsyncpa [#allocation5 + $0x1], 1 }
 0x51e   :  { %1250 = vsyncpa [#allocation6], 1 }
 0x51f   :  { %1252 = vsyncpa [#allocation6 + $0x1], 1 }

// kernel: tpu_custom_call.1
= control target key start
LH: loop header
LB: loop body
LE: loop exit
PB: predicated region body
PF: predicated region fallthrough
CT: control target
= control target key end

     0   :  { %17 = vsyncpa [#allocation5], 0  ;;  %s2033_s0 = inlined_call_operand.vmem [shape: bf16[64,32], index: 0, kind: input, shape index: {}]   ;;  %s2034_s1 = inlined_call_operand.vmem [shape: bf16[32,16], index: 1, kind: input, shape index: {}]   ;;  %s2035_s2 = inlined_call_operand.vmem [shape: f32[1,16], index: 2, kind: input, shape index: {}]   ;;  %s2036_s3 = inlined_call_operand.vmem [shape: bf16[16,8], index: 3, kind: input, shape index: {}]   ;;  %s2037_s4 = inlined_call_operand.vmem [shape: f32[1,8], index: 4, kind: input, shape index: {}]   ;;  %s2038_s5 = inlined_call_operand.vmem [shape: bf16[32,256], index: 5, kind: input, shape index: {}]   ;;  %s2039_s6 = inlined_call_operand.vmem [shape: f32[1,256], index: 6, kind: input, shape index: {}]   ;;  %s2040_s7 = inlined_call_operand.hbm [shape: bf16[256,128], index: 7, kind: input, shape index: {}]   ;;  %s2041_s8 = inlined_call_operand.vmem [shape: bf16[8,128], index: 8, kind: input, shape index: {}]   ;;  %s2042_s9 = inlined_call_operand.vmem [shape: bf16[8,256], index: 9, kind: input, shape index: {}]   ;;  %s2043_s10 = inlined_call_operand.hbm [shape: f32[64,128], index: 10, kind: output, shape index: {0}]   ;;  %s2044_s11 = inlined_call_operand.vmem [shape: f32[64,8], index: 11, kind: output, shape index: {1}]  }
   0x1   :  { %18 = vsyncpa [#allocation6], 0 }
   0x2   :  { %20 = vsyncpa [#allocation6 + $0x1], 0  ;;  %s1786_s17 = smov 0   ;;  %s1788_s18 = smov 0  }
   0x3   :  { %s1790_s19 = smov 0   ;;  %s1792_s20 = smov 0  }
   0x4   :  { %s1794_s21 = smov 0   ;;  %s1796_s22 = smov 0  }
   0x5 LB: > { %2051 = sst [smem:[#allocation10_spill]] %s1713_s21  ;;  %s1369_s23 = sadd.s32 4294967295, %s1717_s22   ;;  %s1717_s22 = sphi %s1796_s22, %s26_s22   ;;  %s1713_s21 = sphi %s1794_s21, %s2065_s21   ;;  %s1709_s20 = sphi %s1792_s20, %s2064_s20   ;;  %s1705_s19 = sphi %s1790_s19, %s2068_s19   ;;  %s1701_s18 = sphi %s1788_s18, %s2067_s18   ;;  %s1697_s17 = sphi %s1786_s17, %s2066_s17  }
   0x6   : > { %s1370_s24 = sadd.s32 4294967294, %s1717_s22   ;;  %s38_s25 = sadd.s32 1, %s1713_s21 }
   0x7   : > { %s280_s26 = sadd.s32 1, %s1705_s19  ;;  %p40_p0 = scmp.ge.s32.totalorder %s38_s25, 2 }
   0x8   : > { %p290_p1 = scmp.ne.s32.totalorder %s1705_s19, %s1701_s18  ;;  %p291_p2 = scmp.eq.s32.totalorder %s1369_s23, 1 }
   0x9   : > { %p296_p3 = scmp.ne.s32.totalorder %s1701_s18, %s1697_s17  ;;  %s2070_s25 = smov (%p40_p0, %s38_s25), 0 }
   0xa   : > { %2052 = sst [smem:[#allocation11_spill]] %s2070_s25  ;;  %p1826_p4 = por %p291_p2, %p290_p1 }
   0xb   : > { %p297_p5 = scmp.eq.s32.totalorder %s1370_s24, 1  ;;  %s277_s28 = ssub.s32 %s1713_s21, %s2070_s25 }
   0xc   : > { %s2053_s27 = scalar_select %p1826_p4, 1, 0 }
   0xd   : > { %p1371_p6 = scmp.ge.s32.totalorder %s1717_s22, 1  ;;  %p278_p7 = scmp.eq.s32.totalorder %s277_s28, 0 }
   0xe   : > { %p1833_p8 = por %p297_p5, %p296_p3  ;;  %p330_p9 = scmp.lt.s32.totalorder %s1717_s22, 3 }
   0xf   : > { %s1839_s30 = scalar_select %p278_p7, %s1705_s19, %s280_s26  }
  0x10   : > { %s2054_s29 = scalar_select %p1833_p8, 1, 0 }
  0x11   : > { %2055 = sst [smem:[#allocation12_spill]] %s1839_s30  ;;  %p1841_p10 = pnand %p1371_p6, %p330_p9 }
  0x12   : > { %p1845_p11 = scmp.eq.s32.totalorder %s1369_s23, 0  ;;  %s1719_s14 = smov [#allocation4]  }
  0x13   : > { %s2056_s12 = scalar_select %p1841_p10, 1, 0 }
  0x14   : > { %s2057_s13 = scalar_select %p1845_p11, 1, 0 }
  0x15   : > { %p1497_p12 = pneg %p1841_p10  ;;  %s374_s15 = sshll.u32 %s1719_s14, 4  ;;  %s375_s15 = int_to_ptr.vmem [resolvable:$true] %s374_s15 }
  0x16   : > { %s1607_s28 = scalar_lea.hbm %s2040_s7, 2048 }
  0x17   : > { %p1853_p13 = pnand %p1845_p11, %p1497_p12  ;;  %p1608_p0 = scmp.ne.s32.totalorder %s2040_s7, %s1607_s28 }
  0x18   : > { %p1614_p5 = scmp.lt.u32.totalorder %s1607_s28, %s2040_s7 }
  0x19   : > { %p1609_p1 = pneg %p1853_p13 }
  0x1b   : > { %p1610_p2 = pnand %p1609_p1, %p1608_p0 }
  0x1d   : > { %p1611_p3 = pneg %p1610_p2 }
  0x1f   : > { %p1616_p6 = pnand %p1614_p5, %p1611_p3 }
  0x21   : > { %1619 = shalt.err (!%p1616_p6)
}
  0x22   : > { %s1620_s30 = scalar_lea.vmem %s375_s15, 2048  ;;  %p1628_p8 = scmp.lt.s32.totalorder %s375_s15, %s375_s15 }
  0x23   : > { %p1621_p7 = scmp.ne.s32.totalorder %s375_s15, %s1620_s30  ;;  %p1629_p4 = scmp.lt.s32.totalorder %s1620_s30, %s1620_s30 }
  0x25   : > { %p1623_p9 = pnand %p1621_p7, %p1609_p1  ;;  %p1630_p11 = por %p1629_p4, %p1628_p8 }
  0x27   : > { %p1624_p12 = pneg %p1623_p9 }
  0x29   : > { %p1631_p10 = pnand %p1630_p11, %p1624_p12 }
  0x2b   : > { %1634 = shalt.err (!%p1631_p10)
}
  0x2c   : > { %s1720_s25 = smov 64   ;;  %s1721_s24 = smov 4  }
  0x2d   : > { %1500 = dma.hbm_to_vmem [thread:$0]  (!%p1853_p13), %s2040_s7, 2048, %s375_s15, [#allocation5], %s1720_s25, %s1720_s25, %s1721_s24  }
  0x2e   : > { %p2059_p0 = scmp.ne.s32.totalorder %s2056_s12, 0 }
  0x2f   : > { %p2060_p2 = scmp.ne.s32.totalorder (!%p2059_p0), %s2057_s13, 0 }
  0x30   : > { %411 = sbr.rel (%p2059_p0) target bundleno = 1292 (0x50c), region = 60 }
  0x37   : > { %1688 = dma.done.wait (%p2060_p2), [#allocation5], 2048  }
  0x38   : > { %1690 = vsyncadd (%p2060_p2), [#allocation5], 4294965248  ;;  %s1380_s21 = sshll.u32 %s1709_s20, 2  ;;  %v1562_v0 = vld [vmem:[%s2034_s1] sm:$0xff]   ;;  %v1563_v1 = vld [vmem:[%s2034_s1 + $0x8] sm:$0xff]   ;;  %vm543_vm0 = vcmask 261120  }
  0x39   : > { %p471_p4 = scmp.lt.s32.totalorder %s1380_s21, 7  ;;  %1470 = vmatprep.subr.bf16.mxu0 %v1562_v0  ;;  %v1566_v4 = vld [vmem:[%s2036_s3] sm:$0xff]   ;;  %vm620_vm1 = vcmask 130048   ;;  %vm676_vm2 = vcmask 64512   ;;  %v1570_v55 = vld [vmem:[%s2038_s5 + $0x14] ss:$8 sps:$4 sm:$0xff]  }
  0x3a   : > { %1471 = vmatpush3.bf16.msra.mxu0 %v1562_v0  ;;  %v1384_v5 = vld [vmem:[%s2035_s2] ss:$0 sm:$0xff]  ;;  %v1567_v53 = vld [vmem:[%s2038_s5 + $0x4] ss:$8 sps:$4 sm:$0xff]   ;;  %v1572_v56 = vld [vmem:[%s2038_s5 + $0x10] ss:$8 sps:$4 sm:$0xff]  }
  0x3b   : > { %s2072_s21 = smov (!%p471_p4, %s1380_s21), 7  ;;  %1472 = vmatprep.subr.bf16.mxu0 %v1563_v1  ;;  %v1391_v20 = vld [vmem:[%s2037_s4] ss:$0 sm:$0xff]  ;;  %792 = vmatprep.subr.bf16.mxu1 %v1567_v53  ;;  %v1722_v57 = vmov 0   ;;  %vm866_vm3 = vcmask 1043456   ;;  %s460_s26 = sand.u32 1, %s1701_s18  }
  0x3c   : > { %s1381_s30 = sshll.u32 %s2072_s21, 2  ;;  %v1569_v54 = vld [vmem:[%s2038_s5] ss:$8 sps:$4 sm:$0xff]   ;;  %824 = vmatprep.mubr.bf16.mxu1 %v1722_v57  ;;  %s1383_s14 = sshll.u32 %s2072_s21, 3 }
  0x3d   : > { %s474_s15 = scalar_lea.vmem %s2033_s0, %s1381_s30  ;;  %793 = vmatpush1.bf16.msra.mxu1 %v1569_v54  ;;  %v853_v58 = vld [vmem:[%s2042_s9] sm:$0xff]  ;;  %s499_s24 = scalar_lea.vmem %s2044_s11, %s1383_s14 }
  0x3e   : > { %v1892_v2 = vld [vmem:[%s474_s15] sm:$0xff]   ;;  %v1896_v3 = vld [vmem:[%s474_s15 + $0x8] sm:$0xff]   ;;  %1473 = vmatpush3.bf16.msra.mxu0 %v1563_v1  ;;  %794 = vmatprep.subr.bf16.mxu1 %v1570_v55  ;;  %v1404_v59 = vcombine.high %v853_v58, %v853_v58  ;;  %v1403_v60 = vcombine.low %v853_v58, %v853_v58  ;;  %s1379_s23 = sshll.u32 %s460_s26, 5  ;;  %s1431_s28 = sshll.u32 %s1709_s20, 9 }
  0x3f   : > { %1474 = vmatprep.mubr.msk.bf16.mxu0 %vm543_vm0, %v1892_v2  ;;  %1478 = vmatprep.subr.bf16.mxu0 %v1566_v4  ;;  %v1134_v62 = vld [vmem:[%s2041_s8] sm:$0xf]  ;;  %s462_s30 = scalar_lea.vmem [#allocation7], %s1379_s23  ;;  %s1985_s12 = scalar_lea.hbm %s2043_s10, %s1431_s28 }
  0x40   : > { %v868_v61 = vsel %vm866_vm3, %v1403_v60, 0  ;;  %v1136_v63 = vsel %vm866_vm3, %v1134_v62, 0  ;;  %v1575_v0 = vld [vmem:[#allocation4 + $0x40] sm:$0xff]   ;;  %s1214_s16 = sshll.u32 %s462_s30, 4  ;;  %s1987_s25 = scalar_lea.sflag [#allocation6], %s460_s26  ;;  %s1980_s16 = int_to_ptr.vmem [resolvable:$true] %s1214_s16 }
  0x41   : > { %1475 = vmatmul.mubr.msk.bf16.vlgmr.msra.gmra.mrb[0].mxu0 %vm543_vm0, %v1896_v3  ;;  %795 = vmatpush1.bf16.msra.mxu1 %v1572_v56  ;;  %v1576_v1 = vld [vmem:[#allocation4] sm:$0xff]   ;;  %p2061_p10 = scmp.ne.s32.totalorder %s2053_s27, 0  ;;  %s1723_s20 = smov [#allocation7]  }
  0x42   : > { %1479 = vmatpush3.bf16.msra.mxu0 %v1566_v4  ;;  %v1577_v4 = vld [vmem:[#allocation4 + $0x48] sm:$0xff]   ;;  %1439 = vmatprep.subr.bf16.mxu1 %v1575_v0  ;;  %s1639_s21 = sshll.u32 %s1723_s20, 4  ;;  %s1640_s21 = int_to_ptr.vmem [resolvable:$false] %s1639_s21 }
  0x43   : > { %1405 = vmatprep.subr.msk.bf16.mxu0 %vm866_vm3, %v1404_v59  ;;  %s1641_s13 = scalar_lea.vmem %s1640_s21, 1024  ;;  %p1642_p1 = scmp.lt.s32.totalorder %s1980_s16, %s1640_s21 }
  0x44   : > { %1401 = vmatmul.mubr.msk.bf16.vlgmr.msra.gmra.mrb[0].mxu1 %vm543_vm0, %v1892_v2  ;;  %v1578_v2 = vld [vmem:[#allocation4 + $0x8] sm:$0xff]  }
  0x45   : > { %834 = vmatprep.mubr.bf16.mxu1 %v1722_v57  ;;  %1440 = vmatpush3.bf16.msra.mxu1 %v1576_v1 }
  0x46   : > { %1441 = vmatprep.subr.bf16.mxu1 %v1577_v4 }
  0x49   : > { %1442 = vmatpush3.bf16.msra.mxu1 %v1578_v2 }
  0x4c   : > { %1402 = vmatmul.mubr.msk.bf16.gmra.mrb[4].mxu1 %vm543_vm0, %v1896_v3  ;;  %v1582_v3 = vld [vmem:[#allocation4 + $0x18] sm:$0xff]  }
 0x114   : > { %v1476_v6 = vpop.f32.mrb[0].mxu0 }
 0x115   : > { %v593_v7 = vadd.f32 %v1476_v6, %v1384_v5  ;;  %v584_v8 = vpop.f32.mrb[1].mxu0  ;;  %v1580_v6 = vld [vmem:[#allocation4 + $0x10] sm:$0xff]  }
 0x116   : > { %v585_v9 = vadd.f32 %v1384_v5, %v584_v8  ;;  %v1477_v10 = vpop.f32.mrb[2].mxu0  ;;  %v1583_v8 = vld [vmem:[#allocation4 + $0x60] sm:$0xff]  }
 0x117   : > { %v596_v11 = vadd.f32 %v1477_v10, %v1384_v5  ;;  %v587_v12 = vpop.f32.mrb[3].mxu0  ;;  %v601_v14 = vmax.f32 %v593_v7, 0.0  ;;  %v1581_v7 = vld [vmem:[#allocation4 + $0x58] sm:$0xff]   ;;  %v1585_v10 = vld [vmem:[#allocation4 + $0x68] sm:$0xff]  }
 0x118   : > { %v588_v13 = vadd.f32 %v1384_v5, %v587_v12  ;;  %v599_v16 = vmax.f32 %v585_v9, 0.0  ;;  %v1579_v5 = vld [vmem:[#allocation4 + $0x50] sm:$0xff]   ;;  %v1584_v9 = vld [vmem:[#allocation4 + $0x20] sm:$0xff]  }
 0x119   : > { %v602_v15 = vmax.f32 %v596_v11, 0.0  ;;  %1443 = vmatprep.subr.bf16.mxu1 %v1579_v5  ;;  %v1586_v11 = vld [vmem:[#allocation4 + $0x28] sm:$0xff]  }
 0x11a   : > { %v600_v17 = vmax.f32 %v588_v13, 0.0  ;;  %1444 = vmatpush3.bf16.msra.mxu1 %v1580_v6 }
 0x11b   : > { %v604_v18 = vpack.c.bf16 %v602_v15, %v601_v14  ;;  %1445 = vmatprep.subr.bf16.mxu1 %v1581_v7 }
 0x11c   : > { %v603_v19 = vpack.c.bf16 %v600_v17, %v599_v16 }
 0x11e   : > { %1480 = vmatprep.mubr.msk.bf16.mxu0 %vm620_vm1, %v603_v19  ;;  %1446 = vmatpush3.bf16.msra.mxu1 %v1582_v3 }
 0x11f   : > { %1481 = vmatmul.mubr.msk.bf16.vlgmr.msra.gmra.mrb[4].mxu0 %vm620_vm1, %v604_v18  ;;  %1447 = vmatprep.subr.bf16.mxu1 %v1583_v8 }
 0x120   : > { %905 = vmatprep.mubr.bf16.mxu0 %v1722_v57  ;;  %874 = vmatpush1.bf16.msra.mxu0 %v868_v61 }
 0x121   : > { %1490 = vmatprep.subr.msk.bf16.mxu0 %vm866_vm3, %v1134_v62 }
 0x122   : > { %1448 = vmatpush3.bf16.msra.mxu1 %v1584_v9 }
 0x123   : > { %1449 = vmatprep.subr.bf16.mxu1 %v1585_v10 }
 0x126   : > { %1450 = vmatpush3.bf16.msra.mxu1 %v1586_v11 }
 0x1f2   : > { %v1482_v21 = vpop.f32.mrb[4].mxu0 }
 0x1f3   : > { %v670_v22 = vadd.f32 %v1482_v21, %v1391_v20  ;;  %v661_v23 = vpop.f32.mrb[5].mxu0 }
 0x1f4   : > { %v662_v24 = vadd.f32 %v1391_v20, %v661_v23  ;;  %v1483_v25 = vpop.f32.mrb[6].mxu0 }
 0x1f5   : > { %v673_v26 = vadd.f32 %v1483_v25, %v1391_v20  ;;  %v664_v27 = vpop.f32.mrb[7].mxu0  ;;  %v683_v28 = vsel %vm676_vm2, %v670_v22, -inf }
 0x1f6   : > { %v665_v29 = vadd.f32 %v1391_v20, %v664_v27  ;;  %684 = vmax.xlane.f32.xlu1 %v683_v28  ;;  %v677_v30 = vsel %vm676_vm2, %v662_v24, -inf }
 0x1f7   : > { %678 = vmax.xlane.f32.xlu0 %v677_v30  ;;  %v686_v31 = vsel %vm676_vm2, %v673_v26, -inf  ;;  %v826_v30 = vpop.f32.mrb[0].mxu1 }
 0x1f8   : > { %v680_v32 = vsel %vm676_vm2, %v665_v29, -inf }
 0x1fa   : > { %687 = vmax.xlane.f32.xlu1 %v686_v31  ;;  %v828_v31 = vpop.f32.mrb[1].mxu1 }
 0x1fb   : > { %681 = vmax.xlane.f32.xlu0 %v680_v32  ;;  %v830_v32 = vpop.f32.mrb[2].mxu1 }
 0x283   : > { %v685_v33 = vpop.xlane.xlu1 %684 }
 0x284   : > { %v691_v34 = vsub.f32 %v670_v22, %v685_v33  ;;  %v679_v35 = vpop.xlane.xlu0 %678  ;;  %v832_v33 = vpop.f32.mrb[3].mxu1 }
 0x285   : > { %v689_v36 = vsub.f32 %v662_v24, %v679_v35  ;;  %v1588_v35 = vld [vmem:[#allocation4 + $0x30] sm:$0xff]  }
 0x286   : > { %v697_v37 = vmul.f32 1.442695, %v691_v34  ;;  %v1587_v34 = vld [vmem:[#allocation4 + $0x70] sm:$0xff]  }
 0x287   : > { %v693_v38 = vmul.f32 1.442695, %v689_v36  ;;  %v688_v39 = vpop.xlane.xlu1 %687  ;;  %v836_v36 = vpop.f32.mrb[4].mxu1  ;;  %1451 = vmatprep.subr.bf16.mxu1 %v1587_v34 }
 0x288   : > { %v692_v40 = vsub.f32 %v673_v26, %v688_v39  ;;  %v682_v41 = vpop.xlane.xlu0 %681  ;;  %1452 = vmatpush3.bf16.msra.mxu1 %v1588_v35  ;;  %v1589_v39 = vld [vmem:[#allocation4 + $0x78] sm:$0xff]  }
 0x289   : > { %1591 = vpow2.f32 %v693_v38  ;;  %v690_v42 = vsub.f32 %v665_v29, %v682_v41  ;;  %v1590_v41 = vld [vmem:[#allocation4 + $0x38] sm:$0xff]   ;;  %1453 = vmatprep.subr.bf16.mxu1 %v1589_v39 }
 0x28a   : > { %1593 = vpow2.f32 %v697_v37  ;;  %v699_v43 = vmul.f32 1.442695, %v692_v40  ;;  %v838_v37 = vpop.f32.mrb[5].mxu1 }
 0x28b   : > { %v695_v44 = vmul.f32 1.442695, %v690_v42  ;;  %v840_v38 = vpop.f32.mrb[6].mxu1  ;;  %v745_v42 = vlaneseq }
 0x28c   : > { %v842_v40 = vpop.f32.mrb[7].mxu1  ;;  %1454 = vmatpush3.bf16.msra.mxu1 %v1590_v41 }
 0x28d   : > { %1595 = vpow2.f32 %v695_v44 }
 0x28e   : > { %1597 = vpow2.f32 %v699_v43  ;;  %v746_v43 = vshrl.u32 %v745_v42, 7 }
 0x290   : > { %v747_v44 = vsub.s32 0, %v746_v43 }
 0x293   : > { %v1913_v45 = vpop.eup %1591 }
 0x294   : > { %v701_v46 = vsel %vm676_vm2, %v1913_v45, 0.0  ;;  %v1917_v47 = vpop.eup %1593 }
 0x295   : > { %702 = vadd.xlane.f32.xlu0 %v701_v46  ;;  %v707_v49 = vsel %vm676_vm2, %v1917_v47, 0.0  ;;  %v751_v46 = vsub.s32 1, %v746_v43 }
 0x297   : > { %v1919_v48 = vpop.eup %1595 }
 0x298   : > { %v704_v50 = vsel %vm676_vm2, %v1919_v48, 0.0  ;;  %v1925_v51 = vpop.eup %1597 }
 0x299   : > { %708 = vadd.xlane.f32.xlu0 %v707_v49  ;;  %705 = vadd.xlane.f32.xlu1 %v704_v50  ;;  %v710_v52 = vsel %vm676_vm2, %v1925_v51, 0.0 }
 0x29d   : > { %711 = vadd.xlane.f32.xlu1 %v710_v52 }
 0x322   : > { %v703_v12 = vpop.xlane.xlu0 %702 }
 0x323   : > { %1599 = vrcp.f32 %v703_v12 }
 0x326   : > { %v706_v13 = vpop.xlane.xlu1 %705  ;;  %v709_v14 = vpop.xlane.xlu0 %708 }
 0x327   : > { %1601 = vrcp.f32 %v706_v13 }
 0x328   : > { %1603 = vrcp.f32 %v709_v14 }
 0x32a   : > { %v712_v15 = vpop.xlane.xlu1 %711 }
 0x32b   : > { %1605 = vrcp.f32 %v712_v15 }
 0x32d   : > { %v1600_v16 = vpop.eup %1599 }
 0x32e   : > { %v714_v17 = vmul.f32 %v1600_v16, %v1913_v45  ;;  %v743_v45 = vld [vmem:[%s2039_s6] sm:$0x3] }
 0x330   : > { %721 = vst.msk [vmem:[#allocation2] sm:$0xff] %vm676_vm2, %v714_v17  ;;  %725 = vst.msk [vmem:[%s499_s24] sm:$0xff] %vm676_vm2, %v714_v17 }
 0x331   : > { %v1602_v18 = vpop.eup %1601 }
 0x332   : > { %v1604_v19 = vpop.eup %1603  ;;  %v716_v20 = vmul.f32 %v1602_v18, %v1919_v48  ;;  %v752_v48 = vrot.slane %v743_v45, %v751_v46 }
 0x333   : > { %v718_v21 = vmul.f32 %v1604_v19, %v1917_v47  ;;  %v748_v47 = vrot.slane %v743_v45, %v747_v44 }
 0x334   : > { %722 = vst.msk [vmem:[#allocation2 + $0x8] sm:$0xff] %vm676_vm2, %v716_v20  ;;  %726 = vst.msk [vmem:[%s499_s24 + $0x8] sm:$0xff] %vm676_vm2, %v716_v20  ;;  %v829_v50 = vadd.f32 %v828_v31, %v752_v48  ;;  %v833_v54 = vadd.f32 %v832_v33, %v752_v48  ;;  %v839_v62 = vadd.f32 %v838_v37, %v752_v48 }
 0x335   : > { %v1606_v22 = vpop.eup %1605  ;;  %723 = vst.msk [vmem:[#allocation2 + $0x10] sm:$0xff] %vm676_vm2, %v718_v21  ;;  %727 = vst.msk [vmem:[%s499_s24 + $0x10] sm:$0xff] %vm676_vm2, %v718_v21  ;;  %v827_v49 = vadd.f32 %v826_v30, %v748_v47  ;;  %v831_v52 = vadd.f32 %v830_v32, %v748_v47  ;;  %v837_v58 = vadd.f32 %v836_v36, %v748_v47 }
 0x336   : > { %v720_v23 = vmul.f32 %v1606_v22, %v1925_v51  ;;  %v846_v53 = vmax.f32 %v829_v50, 0.0  ;;  %v848_v60 = vmax.f32 %v833_v54, 0.0  ;;  %v841_v6 = vadd.f32 %v840_v38, %v748_v47 }
 0x337   : > { %v733_v24 = vld [vmem:[#allocation2] sm:$0xff]  ;;  %v845_v51 = vmax.f32 %v827_v49, 0.0  ;;  %v847_v56 = vmax.f32 %v831_v52, 0.0  ;;  %v849_v2 = vmax.f32 %v837_v58, 0.0  ;;  %v850_v7 = vmax.f32 %v839_v62, 0.0 }
 0x338   : > { %724 = vst.msk [vmem:[#allocation2 + $0x18] sm:$0xff] %vm676_vm2, %v720_v23  ;;  %728 = vst.msk [vmem:[%s499_s24 + $0x18] sm:$0xff] %vm676_vm2, %v720_v23  ;;  %v843_v8 = vadd.f32 %v842_v40, %v752_v48  ;;  %v851_v10 = vmax.f32 %v841_v6, 0.0  ;;  %s1635_s24 = scalar_lea.vmem %s1980_s16, 512 }
 0x339   : > { %p1636_p8 = scmp.ne.s32.totalorder %s1980_s16, %s1635_s24  ;;  %p1643_p3 = scmp.lt.s32.totalorder %s1641_s13, %s1635_s24 }
 0x33a   : > { %v852_v13 = vmax.f32 %v843_v8, 0.0 }
 0x33b   : > { %v734_v25 = vld [vmem:[#allocation2 + $0x8] sm:$0xff]  ;;  %p1637_p11 = pnand %p1636_p8, %p2061_p10  ;;  %p1644_p5 = por %p1643_p3, %p1642_p1 }
 0x33c   : > { %v737_v26 = vpack.c.bf16 %v734_v25, %v733_v24  ;;  %v735_v28 = vld [vmem:[#allocation2 + $0x10] sm:$0xff] }
 0x33d   : > { %p1638_p13 = pneg %p1637_p11 }
 0x33e   : > { %1406 = vmatmul.mubr.msk.bf16.vlgmr.msra.gmra.mrb[8].mxu0 %vm676_vm2, %v737_v26 }
 0x33f   : > { %915 = vmatprep.mubr.bf16.mxu0 %v1722_v57  ;;  %1485 = vmatpush3.bf16.msra.mxu0 %v1136_v63  ;;  %v736_v27 = vld [vmem:[#allocation2 + $0x18] sm:$0xff]  ;;  %p1645_p6 = pnand %p1644_p5, %p1638_p13 }
 0x340   : > { %v738_v29 = vpack.c.bf16 %v736_v27, %v735_v28 }
 0x346   : > { %1407 = vmatmul.mubr.msk.bf16.gmra.mrb[12].mxu0 %vm676_vm2, %v738_v29 }
 0x347   : > { %1486 = vmatprep.mubr.msk.bf16.mxu0 %vm676_vm2, %v737_v26 }
 0x34e   : > { %1487 = vmatmul.mubr.msk.bf16.vlgmr.msra.gmra.mrb[16].mxu0 %vm676_vm2, %v738_v29 }
 0x411   : > { %v907_v55 = vpop.f32.mrb[8].mxu0 }
 0x412   : > { %v926_v57 = vmul.f32 %v907_v55, %v845_v51  ;;  %v909_v59 = vpop.f32.mrb[9].mxu0 }
 0x413   : > { %v927_v61 = vmul.f32 %v909_v59, %v846_v53  ;;  %v911_v63 = vpop.f32.mrb[10].mxu0 }
 0x414   : > { %v928_v0 = vmul.f32 %v911_v63, %v847_v56  ;;  %v913_v1 = vpop.f32.mrb[11].mxu0 }
 0x415   : > { %v929_v4 = vmul.f32 %v913_v1, %v848_v60 }
 0x416   : > { %v934_v5 = vpack.c.bf16 %v928_v0, %v926_v57 }
 0x417   : > { %v935_v3 = vpack.c.bf16 %v929_v4, %v927_v61 }
 0x419   : > { %v917_v9 = vpop.f32.mrb[12].mxu0  ;;  %1102 = vmatprep.mubr.bf16.mxu1 %v935_v3 }
 0x41a   : > { %v930_v11 = vmul.f32 %v917_v9, %v849_v2  ;;  %v919_v12 = vpop.f32.mrb[13].mxu0  ;;  %1103 = vmatmul.mubr.bf16.vlgmr.msra.gmra.mrb[8].mxu1 %v934_v5 }
 0x41b   : > { %v931_v14 = vmul.f32 %v919_v12, %v850_v7  ;;  %v921_v15 = vpop.f32.mrb[14].mxu0 }
 0x41c   : > { %v932_v16 = vmul.f32 %v921_v15, %v851_v10  ;;  %v923_v17 = vpop.f32.mrb[15].mxu0 }
 0x41d   : > { %v933_v18 = vmul.f32 %v923_v17, %v852_v13 }
 0x41e   : > { %v936_v19 = vpack.c.bf16 %v932_v16, %v930_v11 }
 0x41f   : > { %v937_v20 = vpack.c.bf16 %v933_v18, %v931_v14 }
 0x421   : > { %1110 = vmatprep.mubr.bf16.mxu1 %v937_v20  ;;  %v1488_v21 = vpop.f32.mrb[16].mxu0 }
 0x422   : > { %1111 = vmatmul.mubr.bf16.gmra.mrb[12].mxu1 %v936_v19  ;;  %v1172_v22 = vpop.f32.mrb[17].mxu0 }
 0x423   : > { %v1489_v23 = vpop.f32.mrb[18].mxu0 }
 0x424   : > { %v1175_v24 = vpop.f32.mrb[19].mxu0 }
 0x4ed   : > { %v1455_v25 = vpop.f32.mrb[8].mxu1 }
 0x4ee   : > { %v1456_v26 = vpop.f32.mrb[9].mxu1 }
 0x4ef   : > { %v1457_v27 = vadd.f32 %v1456_v26, %v1455_v25  ;;  %v1458_v28 = vpop.f32.mrb[10].mxu1 }
 0x4f0   : > { %v1459_v29 = vpop.f32.mrb[11].mxu1 }
 0x4f1   : > { %v1187_v30 = vadd.f32 %v1457_v27, %v1172_v22  ;;  %v1460_v31 = vadd.f32 %v1459_v29, %v1458_v28 }
 0x4f3   : > { %1191 = vst [vmem:[%s462_s30] sm:$0xff] %v1187_v30  ;;  %v1188_v32 = vadd.f32 %v1460_v31, %v1175_v24 }
 0x4f5   : > { %1192 = vst [vmem:[%s462_s30 + $0x8] sm:$0xff] %v1188_v32  ;;  %v1461_v33 = vpop.f32.mrb[12].mxu1 }
 0x4f6   : > { %v1462_v34 = vpop.f32.mrb[13].mxu1 }
 0x4f7   : > { %v1463_v35 = vadd.f32 %v1462_v34, %v1461_v33  ;;  %v1464_v36 = vpop.f32.mrb[14].mxu1 }
 0x4f8   : > { %v1465_v37 = vpop.f32.mrb[15].mxu1 }
 0x4f9   : > { %v1189_v38 = vadd.f32 %v1488_v21, %v1463_v35  ;;  %v1466_v39 = vadd.f32 %v1465_v37, %v1464_v36 }
 0x4fb   : > { %1193 = vst [vmem:[%s462_s30 + $0x10] sm:$0xff] %v1189_v38  ;;  %v1190_v40 = vadd.f32 %v1489_v23, %v1466_v39 }
 0x4fd   : > { %1194 = vst [vmem:[%s462_s30 + $0x18] sm:$0xff] %v1190_v40 }
 0x4fe   : > { %1648 = shalt.err (!%p1645_p6)
}
 0x4ff   : > { %s1649_s26 = scalar_lea.hbm %s1985_s12, 512  ;;  %s1653_s28 = scalar_lea.hbm %s2043_s10, 1024 }
 0x500   : > { %p1650_p7 = scmp.ne.s32.totalorder %s1985_s12, %s1649_s26  ;;  %p1654_p0 = scmp.lt.u32.totalorder %s1985_s12, %s2043_s10 }
 0x501   : > { %p1655_p2 = scmp.lt.u32.totalorder %s1653_s28, %s1649_s26  ;;  %p1657_p8 = scmp.lt.u32.totalorder %s1649_s26, %s1985_s12 }
 0x502   : > { %p1651_p9 = pnand %p1650_p7, %p2061_p10 }
 0x503   : > { %p1656_p4 = por %p1655_p2, %p1654_p0 }
 0x504   : > { %p1652_p12 = pneg %p1651_p9 }
 0x505   : > { %p1658_p11 = por %p1657_p8, %p1656_p4 }
 0x507   : > { %p1659_p13 = pnand %p1658_p11, %p1652_p12 }
 0x509   : > { %1662 = shalt.err (!%p1659_p13)
}
 0x50a   : > { %s1724_s24 = smov 128   ;;  %s1725_s20 = smov 8  }
 0x50b   : > { %1495 = dma.vmem_to_hbm [thread:$0]  (%p2061_p10), %s1980_s16, 512, %s1985_s12, %s1987_s25, %s1724_s24, %s1724_s24, %s1725_s20  }
 0x50c PF: > { %p1507_p1 = scmp.ge.s32.totalorder %s1717_s22, 2  ;;  %s1233_s21 = sand.u32 1, %s1697_s17  }
 0x50d   : > { %p2062_p3 = scmp.ne.s32.totalorder %s2054_s29, 0  ;;  %s1234_s13 = scalar_lea.sflag [#allocation6], %s1233_s21 }
 0x50f   : > { %p1502_p5 = pnand %p1507_p1, %p2062_p3 }
 0x511   : > { %1692 = dma.done.wait (!%p1502_p5), %s1234_s13, 512  }
 0x512   : > { %1694 = vsyncadd (!%p1502_p5), %s1234_s13, 4294966784  ;;  %s26_s22 = sadd.s32 1, %s1717_s22   ;;  %s2063_s26 = sld [smem:[#allocation12_spill]] }
 0x513   : > { %p23_p6 = scmp.ge.s32.totalorder %s26_s22, 4   ;;  %s2064_s20 = sld [smem:[#allocation10_spill]] }
 0x514   : > { %s2065_s21 = sld [smem:[#allocation11_spill]]  ;;  %s2066_s17 = smov %s1701_s18 }
 0x515   : > { %s2067_s18 = smov %s1705_s19  ;;  %25 = sbr.rel (!%p23_p6) target bundleno = 5 (0x5), region = 130 }
 0x518   : > { %s2068_s19 = smov %s2063_s26 }
 0x51c   :  { %1247 = vsyncpa [#allocation5], 1 }
 0x51d   :  { %1249 = vsyncpa [#allocation5 + $0x1], 1 }
 0x51e   :  { %1250 = vsyncpa [#allocation6], 1 }
 0x51f   :  { %1252 = vsyncpa [#allocation6 + $0x1], 1 }

</bundles_post_ra>
